<compile_context>
chip_gen: v6e
topology: v6e:2x2x1
jax: 0.10.0
libtpu: 0.0.40
codegen_flags: <defaults>
</compile_context>

<pallas_src>
import functools

import jax
import jax.numpy as jnp
from jax.experimental import pallas as pl
from jax.experimental.pallas import tpu as pltpu


TB_MAX = 1024  # max batch-tile rows (tunable)


def _round_up(x, m):
    return (x + m - 1) // m * m


# ---------------------------------------------------------------------------
# Kernels
# ---------------------------------------------------------------------------

def _double_q_kernel_fused(
    s_ref, a_ref,                      # (TB, S), (TB, A)
    w1s_ref, w1a_ref, b1_ref,          # (S, 2H), (A, 2H), (1, 2H)
    w2_ref, b2_ref,                    # (2H, 2H) block-diag, (1, 2H)
    w3_ref, b3_ref,                    # (2H, 2H) block-diag, (1, 2H)
    w4t_ref, b4t_ref,                  # (2, 2H) block-diag^T, (2, 1)
    out_ref,                           # (2, TB): row 0 = q1, row 1 = q2
    *, compute_dtype,
):
    # Layer 1: both nets fused along the output axis; no input concat needed.
    h = (jnp.dot(s_ref[...], w1s_ref[...], preferred_element_type=jnp.float32)
         + jnp.dot(a_ref[...], w1a_ref[...], preferred_element_type=jnp.float32)
         + b1_ref[...])
    h = jnp.maximum(h, 0.0).astype(compute_dtype)

    # Layers 2/3: one block-diagonal (2H x 2H) matmul per layer covers both nets.
    h = jnp.dot(h, w2_ref[...], preferred_element_type=jnp.float32) + b2_ref[...]
    h = jnp.maximum(h, 0.0).astype(compute_dtype)
    h = jnp.dot(h, w3_ref[...], preferred_element_type=jnp.float32) + b3_ref[...]
    h = jnp.maximum(h, 0.0).astype(compute_dtype)

    # Layer 4: lane-dense (2, TB) output, out[n, t] = sum_k w4t[n, k] * h[t, k].
    out = jax.lax.dot_general(
        w4t_ref[...], h, (((1,), (1,)), ((), ())),
        preferred_element_type=jnp.float32)
    out_ref[...] = out + b4t_ref[...]


def _double_q_kernel_split(
    s_ref, a_ref,                      # (TB, S), (TB, A)
    w1s_ref, w1a_ref, b1_ref,          # (S, 2H), (A, 2H), (1, 2H)
    w2_ref, b2_ref,                    # (2, H, H), (1, 2H)
    w3_ref, b3_ref,                    # (2, H, H), (1, 2H)
    w4t_ref, b4t_ref,                  # (2, 2H), (2, 1)
    out_ref,                           # (2, TB)
    *, hidden, compute_dtype,
):
    # v5e path: 128x128 MXU -> skip the zero blocks of the block-diagonal form and
    # run two per-net (H, H) matmuls per hidden layer instead.
    h = (jnp.dot(s_ref[...], w1s_ref[...], preferred_element_type=jnp.float32)
         + jnp.dot(a_ref[...], w1a_ref[...], preferred_element_type=jnp.float32)
         + b1_ref[...])
    h = jnp.maximum(h, 0.0).astype(compute_dtype)
    ha = h[:, :hidden]
    hb = h[:, hidden:]

    for w_ref, b_ref in ((w2_ref, b2_ref), (w3_ref, b3_ref)):
        b = b_ref[...]
        na = jnp.dot(ha, w_ref[0], preferred_element_type=jnp.float32) + b[:, :hidden]
        nb = jnp.dot(hb, w_ref[1], preferred_element_type=jnp.float32) + b[:, hidden:]
        ha = jnp.maximum(na, 0.0).astype(compute_dtype)
        hb = jnp.maximum(nb, 0.0).astype(compute_dtype)

    w4t = w4t_ref[...]
    out = (jax.lax.dot_general(w4t[:, :hidden], ha, (((1,), (1,)), ((), ())),
                               preferred_element_type=jnp.float32)
           + jax.lax.dot_general(w4t[:, hidden:], hb, (((1,), (1,)), ((), ())),
                                 preferred_element_type=jnp.float32))
    out_ref[...] = out + b4t_ref[...]


# ---------------------------------------------------------------------------
# Parameter packing (off the hot path)
# ---------------------------------------------------------------------------

def _block_diag(a, b):
    za = jnp.zeros((a.shape[0], b.shape[1]), a.dtype)
    zb = jnp.zeros((b.shape[0], a.shape[1]), a.dtype)
    return jnp.concatenate(
        [jnp.concatenate([a, za], axis=1),
         jnp.concatenate([zb, b], axis=1)], axis=0)


def _is_v5e():
    try:
        kind = jax.devices()[0].device_kind.lower()
    except Exception:
        return False
    return "v5" in kind and ("lite" in kind or "5e" in kind)


def pack_double_q_params(params1, params2, state_dim, *,
                         compute_dtype=jnp.bfloat16, split_hidden=None):
    """Pack both nets' params into the fused kernel layout.

    params*: [w1, b1, w2, b2, w3, b3, w4, b4] with weights (in, out), biases (1, out).
    split_hidden: None -> auto (True on v5e); True packs layers 2/3 as stacked
    per-net (2, H, H) weights instead of the (2H, 2H) block-diagonal form.
    """
    if split_hidden is None:
        split_hidden = _is_v5e()

    w1a_, b1a, w2a, b2a, w3a, b3a, w4a, b4a = params1
    w1b_, b1b, w2b, b2b, w3b, b3b, w4b, b4b = params2
    hidden = w2a.shape[0]

    w1 = jnp.concatenate([w1a_, w1b_], axis=1)               # (S+A, 2H)
    w1_state = w1[:state_dim].astype(compute_dtype)          # (S, 2H)
    w1_action = w1[state_dim:].astype(compute_dtype)         # (A, 2H)
    b1 = jnp.concatenate([b1a, b1b], axis=1).astype(jnp.float32)

    if split_hidden:
        w2 = jnp.stack([w2a, w2b]).astype(compute_dtype)     # (2, H, H)
        w3 = jnp.stack([w3a, w3b]).astype(compute_dtype)
    else:
        w2 = _block_diag(w2a, w2b).astype(compute_dtype)     # (2H, 2H)
        w3 = _block_diag(w3a, w3b).astype(compute_dtype)
    b2 = jnp.concatenate([b2a, b2b], axis=1).astype(jnp.float32)
    b3 = jnp.concatenate([b3a, b3b], axis=1).astype(jnp.float32)

    w4t = _block_diag(w4a, w4b).T.astype(compute_dtype)      # (2, 2H)
    b4t = jnp.concatenate([b4a, b4b], axis=1).T.astype(jnp.float32)   # (2, 1)

    return dict(split=split_hidden, hidden=hidden, dtype=compute_dtype,
                w1s=w1_state, w1a=w1_action, b1=b1,
                w2=w2, b2=b2, w3=w3, b3=b3, w4t=w4t, b4t=b4t)


# ---------------------------------------------------------------------------
# Forward wrapper
# ---------------------------------------------------------------------------

def _choose_tile(bp):
    # Tiny batches: a single full tile (block dims == array dims, so no (8,128)
    # layout constraints).  Larger batches: a multiple of 128 (needed for the
    # lane-dense (2, TB) output block) sized to give >=2 grid steps so both v7x
    # TensorCores get work, capped at TB_MAX.
    if bp < 256:
        return bp
    return min(TB_MAX, _round_up(pl.cdiv(bp, 2), 128))


def double_q_forward(state, action, packed):
    """state: (B, S), action: (B, A).  Returns (q1, q2), each (B, 1) float32."""
    compute_dtype = packed["dtype"]
    hidden = packed["hidden"]

    B = state.shape[0]
    state = state.astype(compute_dtype)
    action = action.astype(compute_dtype)

    # Only pad the batch to a sublane multiple (<= 7 rows); the grid itself handles
    # the ragged last tile (padded read / masked write) — no pad-to-TB round trip.
    Bp = _round_up(B, 8)
    if Bp != B:
        state = jnp.pad(state, ((0, Bp - B), (0, 0)))
        action = jnp.pad(action, ((0, Bp - B), (0, 0)))

    S = state.shape[1]
    A = action.shape[1]
    TB = _choose_tile(Bp)
    grid = (pl.cdiv(Bp, TB),)

    if packed["split"]:
        kernel = functools.partial(_double_q_kernel_split,
                                   hidden=hidden, compute_dtype=compute_dtype)
    else:
        kernel = functools.partial(_double_q_kernel_fused,
                                   compute_dtype=compute_dtype)

    def _const_spec(x):
        return pl.BlockSpec(x.shape, lambda i, _nd=x.ndim: (0,) * _nd)

    weights = (packed["w1s"], packed["w1a"], packed["b1"],
               packed["w2"], packed["b2"],
               packed["w3"], packed["b3"],
               packed["w4t"], packed["b4t"])

    out = pl.pallas_call(
        kernel,
        out_shape=jax.ShapeDtypeStruct((2, Bp), jnp.float32),
        grid=grid,
        in_specs=[
            pl.BlockSpec((TB, S), lambda i: (i, 0)),
            pl.BlockSpec((TB, A), lambda i: (i, 0)),
        ] + [_const_spec(w) for w in weights],
        out_specs=pl.BlockSpec((2, TB), lambda i: (0, i)),
        compiler_params=pltpu.CompilerParams(
            dimension_semantics=("parallel",),
        ),
    )(state, action, *weights)

    q1 = out[0, :B][:, None]
    q2 = out[1, :B][:, None]
    return q1, q2


def init_mlp_params(key, input_dim, output_dim, hidden_size):
    """Deterministic init; weights are (in, out), biases (1, out)."""
    dims = [(input_dim, hidden_size),
            (hidden_size, hidden_size),
            (hidden_size, hidden_size),
            (hidden_size, output_dim)]
    params = []
    for (din, dout) in dims:
        key, kw, kb = jax.random.split(key, 3)
        scale = 1.0 / jnp.sqrt(jnp.float32(din))
        w = jax.random.uniform(kw, (din, dout), jnp.float32, -scale, scale)
        b = jax.random.uniform(kb, (1, dout), jnp.float32, -scale, scale)
        params += [w, b]
    return params


if __name__ == "__main__":
    # Shapes consistent with DoubleQFunc(state_dim, action_dim, hidden_size=256).
    state_dim, action_dim, hidden_size = 12, 4, 256

    key = jax.random.PRNGKey(0)
    k_s, k_a, k_p1, k_p2, k_s2, k_a2 = jax.random.split(key, 6)

    params1 = init_mlp_params(k_p1, state_dim + action_dim, 1, hidden_size)
    params2 = init_mlp_params(k_p2, state_dim + action_dim, 1, hidden_size)
    packed = pack_double_q_params(params1, params2, state_dim)

    # Pure-JAX f32 reference of the original (unfused) DoubleQFunc math.
    def ref_mlp(x, p):
        w1, b1, w2, b2, w3, b3, w4, b4 = p
        h = jnp.maximum(x @ w1 + b1, 0.0)
        h = jnp.maximum(h @ w2 + b2, 0.0)
        h = jnp.maximum(h @ w3 + b3, 0.0)
        return h @ w4 + b4

    def check(batch, ks, ka):
        state = jax.random.normal(ks, (batch, state_dim), jnp.float32)
        action = jax.random.normal(ka, (batch, action_dim), jnp.float32)
        q1, q2 = double_q_forward(state, action, packed)
        q1 = jax.block_until_ready(q1)
        q2 = jax.block_until_ready(q2)
        x = jnp.concatenate([state, action], axis=1)
        r1 = ref_mlp(x, params1)
        r2 = ref_mlp(x, params2)
        assert q1.shape == (batch, 1) and q2.shape == (batch, 1)
        # bf16 MXU path (f32 accumulation) -> loose-ish tolerance vs f32 reference.
        assert jnp.allclose(q1, r1, atol=5e-2, rtol=5e-2), float(jnp.max(jnp.abs(q1 - r1)))
        assert jnp.allclose(q2, r2, atol=5e-2, rtol=5e-2), float(jnp.max(jnp.abs(q2 - r2)))

    # Small batch: single full-batch tile path.
    check(8, k_s, k_a)
    # Larger batch: multi-step grid with a ragged (masked-write) last tile.
    check(404, k_s2, k_a2)

    print("KERNEL_OK")
</pallas_src>

<mosaic_0001>
module attributes {stable_mosaic.version = 11 : i64} {
  func.func @_double_q_kernel_fused(%arg0: i32, %arg1: memref<8x12xbf16, #tpu.memory_space<vmem>>, %arg2: memref<8x4xbf16, #tpu.memory_space<vmem>>, %arg3: memref<12x512xbf16, #tpu.memory_space<vmem>>, %arg4: memref<4x512xbf16, #tpu.memory_space<vmem>>, %arg5: memref<1x512xf32, #tpu.memory_space<vmem>>, %arg6: memref<512x512xbf16, #tpu.memory_space<vmem>>, %arg7: memref<1x512xf32, #tpu.memory_space<vmem>>, %arg8: memref<512x512xbf16, #tpu.memory_space<vmem>>, %arg9: memref<1x512xf32, #tpu.memory_space<vmem>>, %arg10: memref<2x512xbf16, #tpu.memory_space<vmem>>, %arg11: memref<2x1xf32, #tpu.memory_space<vmem>>, %arg12: memref<2x8xf32, #tpu.memory_space<vmem>>) attributes {dimension_semantics = [#tpu.dimension_semantics<parallel>], iteration_bounds = array<i64: 1>, scalar_prefetch = 0 : i64, scratch_operands = 0 : i64, tpu.core_type = #tpu.core_type<tc>, window_params = [{transform_indices = @transform_0, window_bounds = array<i64: 8, 12>}, {transform_indices = @transform_1, window_bounds = array<i64: 8, 4>}, {pipeline_mode = #tpu.pipeline_mode<synchronous>, transform_indices = @transform_2, window_bounds = array<i64: 12, 512>}, {pipeline_mode = #tpu.pipeline_mode<synchronous>, transform_indices = @transform_3, window_bounds = array<i64: 4, 512>}, {pipeline_mode = #tpu.pipeline_mode<synchronous>, transform_indices = @transform_4, window_bounds = array<i64: 1, 512>}, {pipeline_mode = #tpu.pipeline_mode<synchronous>, transform_indices = @transform_5, window_bounds = array<i64: 512, 512>}, {pipeline_mode = #tpu.pipeline_mode<synchronous>, transform_indices = @transform_6, window_bounds = array<i64: 1, 512>}, {pipeline_mode = #tpu.pipeline_mode<synchronous>, transform_indices = @transform_7, window_bounds = array<i64: 512, 512>}, {pipeline_mode = #tpu.pipeline_mode<synchronous>, transform_indices = @transform_8, window_bounds = array<i64: 1, 512>}, {pipeline_mode = #tpu.pipeline_mode<synchronous>, transform_indices = @transform_9, window_bounds = array<i64: 2, 512>}, {pipeline_mode = #tpu.pipeline_mode<synchronous>, transform_indices = @transform_10, window_bounds = array<i64: 2, 1>}, {transform_indices = @transform_11, window_bounds = array<i64: 2, 8>}]} {
    %c0 = arith.constant 0 : index
    %c0_0 = arith.constant 0 : index
    %0 = vector.load %arg1[%c0, %c0_0] : memref<8x12xbf16, #tpu.memory_space<vmem>>, vector<8x12xbf16>
    %c0_1 = arith.constant 0 : index
    %c0_2 = arith.constant 0 : index
    %1 = vector.load %arg3[%c0_1, %c0_2] : memref<12x512xbf16, #tpu.memory_space<vmem>>, vector<12x512xbf16>
    %cst = arith.constant dense<0.000000e+00> : vector<8x512xf32>
    %2 = tpu.matmul %0, %1, %cst {dimension_numbers = #tpu.dot_dimension_numbers<[1], [0], [0], [1], [0, 0, 1, 1], [], []>} : vector<8x12xbf16>, vector<12x512xbf16>, vector<8x512xf32> -> vector<8x512xf32>
    %c0_3 = arith.constant 0 : index
    %c0_4 = arith.constant 0 : index
    %3 = vector.load %arg2[%c0_3, %c0_4] : memref<8x4xbf16, #tpu.memory_space<vmem>>, vector<8x4xbf16>
    %c0_5 = arith.constant 0 : index
    %c0_6 = arith.constant 0 : index
    %4 = vector.load %arg4[%c0_5, %c0_6] : memref<4x512xbf16, #tpu.memory_space<vmem>>, vector<4x512xbf16>
    %cst_7 = arith.constant dense<0.000000e+00> : vector<8x512xf32>
    %5 = tpu.matmul %3, %4, %cst_7 {dimension_numbers = #tpu.dot_dimension_numbers<[1], [0], [0], [1], [0, 0, 1, 1], [], []>} : vector<8x4xbf16>, vector<4x512xbf16>, vector<8x512xf32> -> vector<8x512xf32>
    %6 = arith.addf %2, %5 : vector<8x512xf32>
    %c0_8 = arith.constant 0 : index
    %c0_9 = arith.constant 0 : index
    %7 = vector.load %arg5[%c0_8, %c0_9] : memref<1x512xf32, #tpu.memory_space<vmem>>, vector<1x512xf32>
    %8 = vector.broadcast %7 : vector<1x512xf32> to vector<8x512xf32>
    %9 = arith.addf %6, %8 : vector<8x512xf32>
    %cst_10 = arith.constant 0.000000e+00 : f32
    %10 = vector.broadcast %cst_10 : f32 to vector<8x512xf32>
    %11 = arith.maximumf %9, %10 : vector<8x512xf32>
    %12 = arith.truncf %11 : vector<8x512xf32> to vector<8x512xbf16>
    %c0_11 = arith.constant 0 : index
    %c0_12 = arith.constant 0 : index
    %13 = vector.load %arg6[%c0_11, %c0_12] : memref<512x512xbf16, #tpu.memory_space<vmem>>, vector<512x512xbf16>
    %cst_13 = arith.constant dense<0.000000e+00> : vector<8x512xf32>
    %14 = tpu.matmul %12, %13, %cst_13 {dimension_numbers = #tpu.dot_dimension_numbers<[1], [0], [0], [1], [0, 0, 1, 1], [], []>} : vector<8x512xbf16>, vector<512x512xbf16>, vector<8x512xf32> -> vector<8x512xf32>
    %c0_14 = arith.constant 0 : index
    %c0_15 = arith.constant 0 : index
    %15 = vector.load %arg7[%c0_14, %c0_15] : memref<1x512xf32, #tpu.memory_space<vmem>>, vector<1x512xf32>
    %16 = vector.broadcast %15 : vector<1x512xf32> to vector<8x512xf32>
    %17 = arith.addf %14, %16 : vector<8x512xf32>
    %cst_16 = arith.constant 0.000000e+00 : f32
    %18 = vector.broadcast %cst_16 : f32 to vector<8x512xf32>
    %19 = arith.maximumf %17, %18 : vector<8x512xf32>
    %20 = arith.truncf %19 : vector<8x512xf32> to vector<8x512xbf16>
    %c0_17 = arith.constant 0 : index
    %c0_18 = arith.constant 0 : index
    %21 = vector.load %arg8[%c0_17, %c0_18] : memref<512x512xbf16, #tpu.memory_space<vmem>>, vector<512x512xbf16>
    %cst_19 = arith.constant dense<0.000000e+00> : vector<8x512xf32>
    %22 = tpu.matmul %20, %21, %cst_19 {dimension_numbers = #tpu.dot_dimension_numbers<[1], [0], [0], [1], [0, 0, 1, 1], [], []>} : vector<8x512xbf16>, vector<512x512xbf16>, vector<8x512xf32> -> vector<8x512xf32>
    %c0_20 = arith.constant 0 : index
    %c0_21 = arith.constant 0 : index
    %23 = vector.load %arg9[%c0_20, %c0_21] : memref<1x512xf32, #tpu.memory_space<vmem>>, vector<1x512xf32>
    %24 = vector.broadcast %23 : vector<1x512xf32> to vector<8x512xf32>
    %25 = arith.addf %22, %24 : vector<8x512xf32>
    %cst_22 = arith.constant 0.000000e+00 : f32
    %26 = vector.broadcast %cst_22 : f32 to vector<8x512xf32>
    %27 = arith.maximumf %25, %26 : vector<8x512xf32>
    %28 = arith.truncf %27 : vector<8x512xf32> to vector<8x512xbf16>
    %c0_23 = arith.constant 0 : index
    %c0_24 = arith.constant 0 : index
    %29 = vector.load %arg10[%c0_23, %c0_24] : memref<2x512xbf16, #tpu.memory_space<vmem>>, vector<2x512xbf16>
    %cst_25 = arith.constant dense<0.000000e+00> : vector<2x8xf32>
    %30 = tpu.matmul %29, %28, %cst_25 {dimension_numbers = #tpu.dot_dimension_numbers<[1], [1], [0], [0], [0, 0, 1, 0], [], []>} : vector<2x512xbf16>, vector<8x512xbf16>, vector<2x8xf32> -> vector<2x8xf32>
    %c0_26 = arith.constant 0 : index
    %c0_27 = arith.constant 0 : index
    %31 = vector.load %arg11[%c0_26, %c0_27] : memref<2x1xf32, #tpu.memory_space<vmem>>, vector<2x1xf32>
    %32 = vector.broadcast %31 : vector<2x1xf32> to vector<2x8xf32>
    %33 = arith.addf %30, %32 : vector<2x8xf32>
    %c0_28 = arith.constant 0 : index
    %c0_29 = arith.constant 0 : index
    %34 = vector.load %arg12[%c0_28, %c0_29] : memref<2x8xf32, #tpu.memory_space<vmem>>, vector<2x8xf32>
    tpu.vector_store %arg12[%c0_28, %c0_29], %33 {strides = array<i32>} : memref<2x8xf32, #tpu.memory_space<vmem>>, vector<2x8xf32>,
    return
  }
  func.func @transform_0(%arg0: i32) -> (i32, i32) {
    %c0_i32 = arith.constant 0 : i32
    %c0_i32_0 = arith.constant 0 : i32
    return %arg0, %c0_i32 : i32, i32
  }
  func.func @transform_1(%arg0: i32) -> (i32, i32) {
    %c0_i32 = arith.constant 0 : i32
    %c0_i32_0 = arith.constant 0 : i32
    return %arg0, %c0_i32 : i32, i32
  }
  func.func @transform_2(%arg0: i32) -> (i32, i32) {
    %c0_i32 = arith.constant 0 : i32
    %c0_i32_0 = arith.constant 0 : i32
    %c0_i32_1 = arith.constant 0 : i32
    return %c0_i32, %c0_i32_0 : i32, i32
  }
  func.func @transform_3(%arg0: i32) -> (i32, i32) {
    %c0_i32 = arith.constant 0 : i32
    %c0_i32_0 = arith.constant 0 : i32
    %c0_i32_1 = arith.constant 0 : i32
    return %c0_i32, %c0_i32_0 : i32, i32
  }
  func.func @transform_4(%arg0: i32) -> (i32, i32) {
    %c0_i32 = arith.constant 0 : i32
    %c0_i32_0 = arith.constant 0 : i32
    %c0_i32_1 = arith.constant 0 : i32
    return %c0_i32, %c0_i32_0 : i32, i32
  }
  func.func @transform_5(%arg0: i32) -> (i32, i32) {
    %c0_i32 = arith.constant 0 : i32
    %c0_i32_0 = arith.constant 0 : i32
    %c0_i32_1 = arith.constant 0 : i32
    return %c0_i32, %c0_i32_0 : i32, i32
  }
  func.func @transform_6(%arg0: i32) -> (i32, i32) {
    %c0_i32 = arith.constant 0 : i32
    %c0_i32_0 = arith.constant 0 : i32
    %c0_i32_1 = arith.constant 0 : i32
    return %c0_i32, %c0_i32_0 : i32, i32
  }
  func.func @transform_7(%arg0: i32) -> (i32, i32) {
    %c0_i32 = arith.constant 0 : i32
    %c0_i32_0 = arith.constant 0 : i32
    %c0_i32_1 = arith.constant 0 : i32
    return %c0_i32, %c0_i32_0 : i32, i32
  }
  func.func @transform_8(%arg0: i32) -> (i32, i32) {
    %c0_i32 = arith.constant 0 : i32
    %c0_i32_0 = arith.constant 0 : i32
    %c0_i32_1 = arith.constant 0 : i32
    return %c0_i32, %c0_i32_0 : i32, i32
  }
  func.func @transform_9(%arg0: i32) -> (i32, i32) {
    %c0_i32 = arith.constant 0 : i32
    %c0_i32_0 = arith.constant 0 : i32
    %c0_i32_1 = arith.constant 0 : i32
    return %c0_i32, %c0_i32_0 : i32, i32
  }
  func.func @transform_10(%arg0: i32) -> (i32, i32) {
    %c0_i32 = arith.constant 0 : i32
    %c0_i32_0 = arith.constant 0 : i32
    %c0_i32_1 = arith.constant 0 : i32
    return %c0_i32, %c0_i32_0 : i32, i32
  }
  func.func @transform_11(%arg0: i32) -> (i32, i32) {
    %c0_i32 = arith.constant 0 : i32
    %c0_i32_0 = arith.constant 0 : i32
    return %c0_i32, %arg0 : i32, i32
  }
}

</mosaic_0001>

<bundles_post_ra>
// kernel: tpu_custom_call.1
= control target key start
LH: loop header
LB: loop body
LE: loop exit
PB: predicated region body
PF: predicated region fallthrough
CT: control target
= control target key end

     0   :  { %16 = vsyncpa [#allocation3], 0  ;;  %s3377_s0 = inlined_call_operand.vmem [shape: bf16[8,12], index: 0, kind: input, shape index: {}]   ;;  %s3378_s1 = inlined_call_operand.vmem [shape: bf16[8,4], index: 1, kind: input, shape index: {}]   ;;  %s3379_s2 = inlined_call_operand.hbm [shape: bf16[12,512], index: 2, kind: input, shape index: {}]   ;;  %s3380_s3 = inlined_call_operand.vmem [shape: bf16[4,512], index: 3, kind: input, shape index: {}]   ;;  %s3381_s4 = inlined_call_operand.vmem [shape: f32[1,512], index: 4, kind: input, shape index: {}]   ;;  %s3382_s5 = inlined_call_operand.hbm [shape: bf16[512,512], index: 5, kind: input, shape index: {}]   ;;  %s3383_s6 = inlined_call_operand.hbm [shape: f32[1,512], index: 6, kind: input, shape index: {}]   ;;  %s3384_s7 = inlined_call_operand.hbm [shape: bf16[512,512], index: 7, kind: input, shape index: {}]   ;;  %s3385_s8 = inlined_call_operand.vmem [shape: f32[1,512], index: 8, kind: input, shape index: {}]   ;;  %s3386_s9 = inlined_call_operand.vmem [shape: bf16[2,512], index: 9, kind: input, shape index: {}]   ;;  %s3387_s10 = inlined_call_operand.vmem [shape: f32[2,1], index: 10, kind: input, shape index: {}]   ;;  %s3388_s11 = inlined_call_operand.hbm [shape: f32[2,8], index: 11, kind: output, shape index: {}]  }
   0x1   :  { %17 = vsyncpa [#allocation6], 0 }
   0x2   :  { %18 = vsyncpa [#allocation9], 0 }
   0x3   :  { %19 = vsyncpa [#allocation4], 0  ;;  %s3204_s17 = smov [#allocation5]   ;;  %s3205_s19 = smov [#allocation2]  }
   0x4   :  { %s45_s18 = sshll.u32 %s3204_s17, 4  ;;  %s29_s20 = sshll.u32 %s3205_s19, 4  ;;  %s46_s18 = int_to_ptr.vmem [resolvable:$true] %s45_s18  ;;  %s30_s20 = int_to_ptr.vmem [resolvable:$true] %s29_s20 }
   0x5   :  { %s3104_s21 = scalar_lea.vmem %s46_s18, 16384  ;;  %p3109_p1 = scmp.lt.s32.totalorder %s46_s18, %s46_s18 }
   0x6   :  { %p3105_p0 = scmp.ne.s32.totalorder %s46_s18, %s3104_s21  ;;  %p3110_p2 = scmp.lt.s32.totalorder %s3104_s21, %s3104_s21 }
   0x8   :  { %p3111_p3 = por %p3110_p2, %p3109_p1 }
   0xa   :  { %p3112_p4 = pnand %p3111_p3, %p3105_p0 }
   0xc   :  { %3115 = shalt.err (!%p3112_p4)
}
   0xd   :  { %s3206_s22 = smov 256   ;;  %s3207_s23 = smov 16  }
   0xe   :  { %51 = dma.hbm_to_vmem [thread:$0]  %s3382_s5, 16384, %s46_s18, [#allocation6], %s3206_s22, %s3206_s22, %s3207_s23  }
   0xf   :  { %s3124_s26 = scalar_lea.vmem %s30_s20, 512  ;;  %p3129_p6 = scmp.lt.s32.totalorder %s30_s20, %s30_s20 }
  0x10   :  { %p3125_p5 = scmp.ne.s32.totalorder %s30_s20, %s3124_s26  ;;  %p3130_p7 = scmp.lt.s32.totalorder %s3124_s26, %s3124_s26 }
  0x12   :  { %p3131_p8 = por %p3130_p7, %p3129_p6 }
  0x14   :  { %p3132_p9 = pnand %p3131_p8, %p3125_p5 }
  0x16   :  { %3135 = shalt.err (!%p3132_p9)
}
  0x17   :  { %35 = dma.hbm_to_vmem [thread:$0]  %s3379_s2, 512, %s30_s20, [#allocation3], %s3206_s22, %s3206_s22, %s3207_s23  }
  0x18   :  { %s3208_s29 = smov [#allocation7]   ;;  %s3209_s12 = smov [#allocation8]  }
  0x19   :  { %s58_s30 = sshll.u32 %s3208_s29, 4  ;;  %s67_s13 = sshll.u32 %s3209_s12, 4  ;;  %s59_s30 = int_to_ptr.vmem [resolvable:$true] %s58_s30  ;;  %s68_s13 = int_to_ptr.vmem [resolvable:$true] %s67_s13 }
  0x1a   :  { %s3144_s5 = scalar_lea.vmem %s59_s30, 64  ;;  %p3149_p11 = scmp.lt.s32.totalorder %s59_s30, %s59_s30 }
  0x1b   :  { %p3145_p10 = scmp.ne.s32.totalorder %s59_s30, %s3144_s5  ;;  %p3150_p12 = scmp.lt.s32.totalorder %s3144_s5, %s3144_s5 }
  0x1d   :  { %p3151_p13 = por %p3150_p12, %p3149_p11 }
  0x1f   :  { %p3152_p0 = pnand %p3151_p13, %p3145_p10 }
  0x21   :  { %3155 = shalt.err (!%p3152_p0)
}
  0x22   :  { %61 = dma.hbm_to_vmem [thread:$0]  %s3383_s6, 64, %s59_s30, [#allocation6]  }
  0x23   :  { %s3164_s16 = scalar_lea.vmem %s68_s13, 16384  ;;  %p3169_p2 = scmp.lt.s32.totalorder %s68_s13, %s68_s13 }
  0x24   :  { %p3165_p1 = scmp.ne.s32.totalorder %s68_s13, %s3164_s16  ;;  %p3170_p3 = scmp.lt.s32.totalorder %s3164_s16, %s3164_s16 }
  0x26   :  { %p3171_p4 = por %p3170_p3, %p3169_p2 }
  0x28   :  { %p3172_p5 = pnand %p3171_p4, %p3165_p1 }
  0x2a   :  { %3175 = shalt.err (!%p3172_p5)
}
  0x2b   :  { %73 = dma.hbm_to_vmem [thread:$0]  %s3384_s7, 16384, %s68_s13, [#allocation9], %s3206_s22, %s3206_s22, %s3207_s23  }
  0x2c   :  { %3196 = dma.done.wait [#allocation3], 512  }
  0x2d   :  { %3197 = vsyncadd [#allocation3], 4294966784 }
  0x2e   :  { %3198 = dma.done.wait [#allocation6], 16448  }
  0x2f   :  { %3199 = vsyncadd [#allocation6], 4294950848 }
  0x30   :  { %3200 = dma.done.wait [#allocation9], 16384  }
  0x31   :  { %3201 = vsyncadd [#allocation9], 4294950912  ;;  %v105_v0 = vlaneseq  ;;  %v3210_v1 = vmov 1983009808   ;;  %v3211_v3 = vmov 0   ;;  %v99_v7 = vld [vmem:[%s3380_s3] sm:$0xff] }
  0x32   :  { %v103_v2 = vunpack.c.l.s4 %v3210_v1  ;;  %167 = vmatprep.mubr.bf16.mxu0 %v3211_v3  ;;  %208 = vmatprep.mubr.bf16.mxu1 %v3211_v3  ;;  %vm122_vm0 = vcmask 1041408   ;;  %v101_v9 = vcombine.high %v99_v7, %v99_v7  ;;  %v2706_v10 = vld [vmem:[#allocation2 + $0x4] ss:$16 sps:$4 sm:$0x3f]   ;;  %vm237_vm1 = vcmask 1045504  }
  0x33   :  { %v3295_v4 = vshrl.u32 %v105_v0, 7  ;;  %2704 = vset.pattern.permute.xlu0 %v3211_v3  ;;  %v2708_v14 = vld [vmem:[#allocation2] ss:$16 sps:$4 sm:$0x3f]   ;;  %vm118_vm2 = vcmask 31744   ;;  %vm233_vm3 = vcmask 97280  }
  0x34   :  { %v104_v5 = vunpack.c.0.s8 %v103_v2  ;;  %v2709_v15 = vld [vmem:[#allocation2 + $0xc] ss:$16 sps:$4 sm:$0x3f]   ;;  %v2711_v18 = vld [vmem:[#allocation2 + $0x8] ss:$16 sps:$4 sm:$0x3f]  }
  0x35   :  { %v98_v19 = vld [vmem:[%s3378_s1] sm:$0xf]  ;;  %v239_v20 = vsel %vm237_vm1, %v2708_v14, 0  ;;  %v2714_v21 = vld [vmem:[#allocation5 + $0xe4] ss:$16 sps:$4 sm:$0xff]   ;;  %v245_v22 = vsel %vm237_vm1, %v2711_v18, 0 }
  0x36   :  { %v107_v6 = vsub.s32 %v104_v5, %v3295_v4  ;;  %v2717_v23 = vld [vmem:[#allocation5 + $0x2e4] ss:$16 sps:$4 sm:$0xff]   ;;  %v93_v24 = vld [vmem:[%s3377_s0] sm:$0xf]  ;;  %vm2406_vm4 = vcmask 58368  }
  0x37   :  { %v2712_v25 = vld [vmem:[#allocation5 + $0xe0] ss:$16 sps:$4 sm:$0xff]   ;;  %v2720_v26 = vld [vmem:[#allocation5 + $0xc4] ss:$16 sps:$4 sm:$0xff]  }
  0x38   :  { %v108_v8 = vrot.slane %v99_v7, %v107_v6  ;;  %v115_v13 = vrot.slane %v101_v9, %v107_v6  ;;  %v2715_v27 = vld [vmem:[#allocation5 + $0x2e0] ss:$16 sps:$4 sm:$0xff]   ;;  %v2723_v28 = vld [vmem:[#allocation5 + $0x2c4] ss:$16 sps:$4 sm:$0xff]  }
  0x39   :  { %v2718_v29 = vld [vmem:[#allocation5 + $0xc0] ss:$16 sps:$4 sm:$0xff]   ;;  %v2726_v30 = vld [vmem:[#allocation5 + $0xa4] ss:$16 sps:$4 sm:$0xff]  }
  0x3a   :  { %v116_v11 = vcombine.high %v108_v8, %v108_v8  ;;  %v124_v12 = vsel %vm122_vm0, %v108_v8, 0  ;;  %v117_v16 = vcombine.high %v115_v13, %v115_v13  ;;  %v130_v17 = vsel %vm122_vm0, %v115_v13, 0  ;;  %v2721_v31 = vld [vmem:[#allocation5 + $0x2c0] ss:$16 sps:$4 sm:$0xff]   ;;  %v2729_v32 = vld [vmem:[#allocation5 + $0x2a4] ss:$16 sps:$4 sm:$0xff]  }
  0x3b   :  { %v2724_v33 = vld [vmem:[#allocation5 + $0xa0] ss:$16 sps:$4 sm:$0xff]   ;;  %v2732_v34 = vld [vmem:[#allocation5 + $0x84] ss:$16 sps:$4 sm:$0xff]  }
  0x3c   :  { %2425 = vmatprep.subr.msk.bf16.mxu0 %vm122_vm0, %v116_v11  ;;  %2427 = vmatprep.subr.msk.bf16.mxu1 %vm122_vm0, %v117_v16  ;;  %v2727_v35 = vld [vmem:[#allocation5 + $0x2a0] ss:$16 sps:$4 sm:$0xff]   ;;  %v2735_v36 = vld [vmem:[#allocation5 + $0x284] ss:$16 sps:$4 sm:$0xff]  }
  0x3d   :  { %150 = vmatpush1.bf16.msra.mxu0 %v124_v12  ;;  %191 = vmatpush1.bf16.msra.mxu1 %v130_v17  ;;  %v2730_v37 = vld [vmem:[#allocation5 + $0x80] ss:$16 sps:$4 sm:$0xff]   ;;  %v2738_v38 = vld [vmem:[#allocation5 + $0x64] ss:$16 sps:$4 sm:$0xff]  }
  0x3e   :  { %2433 = vmatprep.subr.msk.bf16.mxu0 %vm237_vm1, %v2706_v10  ;;  %2435 = vmatprep.subr.msk.bf16.mxu1 %vm237_vm1, %v2709_v15  ;;  %v2733_v39 = vld [vmem:[#allocation5 + $0x280] ss:$16 sps:$4 sm:$0xff]   ;;  %v2741_v40 = vld [vmem:[#allocation5 + $0x264] ss:$16 sps:$4 sm:$0xff]  }
  0x3f   :  { %v2736_v41 = vld [vmem:[#allocation5 + $0x60] ss:$16 sps:$4 sm:$0xff]   ;;  %v2744_v43 = vld [vmem:[#allocation5 + $0x44] ss:$16 sps:$4 sm:$0xff]  }
  0x40   :  { %2426 = vmatmul.mubr.msk.bf16.vlgmr.msra.gmra.mxu0 %vm118_vm2, %v98_v19  ;;  %2428 = vmatmul.mubr.msk.bf16.vlgmr.msra.gmra.mxu1 %vm118_vm2, %v98_v19  ;;  %v2739_v42 = vld [vmem:[#allocation5 + $0x260] ss:$16 sps:$4 sm:$0xff]   ;;  %v2747_v45 = vld [vmem:[#allocation5 + $0x244] ss:$16 sps:$4 sm:$0xff]  }
  0x41   :  { %265 = vmatpush1.bf16.msra.mxu0 %v239_v20  ;;  %282 = vmatprep.mubr.bf16.mxu0 %v3211_v3  ;;  %v2742_v44 = vld [vmem:[#allocation5 + $0x40] ss:$16 sps:$4 sm:$0xff]   ;;  %v2750_v47 = vld [vmem:[#allocation5 + $0x24] ss:$16 sps:$4 sm:$0xff]  }
  0x42   :  { %1156 = vmatprep.subr.bf16.mxu0 %v2714_v21  ;;  %306 = vmatpush1.bf16.msra.mxu1 %v245_v22  ;;  %v2745_v46 = vld [vmem:[#allocation5 + $0x240] ss:$16 sps:$4 sm:$0xff]   ;;  %v2753_v48 = vld [vmem:[#allocation5 + $0x224] ss:$16 sps:$4 sm:$0xff]  }
  0x43   :  { %323 = vmatprep.mubr.bf16.mxu1 %v3211_v3  ;;  %1197 = vmatprep.subr.bf16.mxu1 %v2717_v23  ;;  %v2748_v49 = vld [vmem:[#allocation5 + $0x20] ss:$16 sps:$4 sm:$0xff]   ;;  %v2756_v50 = vld [vmem:[#allocation5 + $0x4] ss:$16 sps:$4 sm:$0xff]  }
  0x44   :  { %v2751_v51 = vld [vmem:[#allocation5 + $0x220] ss:$16 sps:$4 sm:$0xff]   ;;  %v2759_v52 = vld [vmem:[#allocation5 + $0x204] ss:$16 sps:$4 sm:$0xff]  }
  0x45   :  { %v2754_v53 = vld [vmem:[#allocation5] ss:$16 sps:$4 sm:$0xff]   ;;  %v2762_v54 = vld [vmem:[#allocation5 + $0x1e4] ss:$16 sps:$4 sm:$0xff]  }
  0x46   :  { %v2757_v55 = vld [vmem:[#allocation5 + $0x200] ss:$16 sps:$4 sm:$0xff]   ;;  %v2765_v56 = vld [vmem:[#allocation5 + $0x3e4] ss:$16 sps:$4 sm:$0xff]  }
  0x47   :  { %v2760_v57 = vld [vmem:[#allocation5 + $0x1e0] ss:$16 sps:$4 sm:$0xff]   ;;  %v2768_v58 = vld [vmem:[#allocation5 + $0x1c4] ss:$16 sps:$4 sm:$0xff]  }
  0x48   :  { %2434 = vmatmul.mubr.msk.bf16.vlgmr.msra.gmra.mxu0 %vm233_vm3, %v93_v24  ;;  %2436 = vmatmul.mubr.msk.bf16.vlgmr.msra.gmra.mxu1 %vm233_vm3, %v93_v24  ;;  %v2763_v59 = vld [vmem:[#allocation5 + $0x3e0] ss:$16 sps:$4 sm:$0xff]   ;;  %v2771_v60 = vld [vmem:[#allocation5 + $0x3c4] ss:$16 sps:$4 sm:$0xff]   ;;  %v2810_v24 = vld [vmem:[#allocation5 + $0xec] ss:$16 sps:$4 sm:$0xff]  }
  0x49   :  { %1157 = vmatpush1.bf16.msra.mxu0 %v2712_v25  ;;  %1198 = vmatpush1.bf16.msra.mxu1 %v2715_v27  ;;  %v2766_v61 = vld [vmem:[#allocation5 + $0x1c0] ss:$16 sps:$4 sm:$0xff]   ;;  %v2774_v62 = vld [vmem:[#allocation5 + $0x1a4] ss:$16 sps:$4 sm:$0xff]   ;;  %v2813_v25 = vld [vmem:[#allocation5 + $0x2ec] ss:$16 sps:$4 sm:$0xff]  }
  0x4a   :  { %1158 = vmatprep.subr.bf16.mxu0 %v2720_v26  ;;  %1199 = vmatprep.subr.bf16.mxu1 %v2723_v28  ;;  %v2769_v63 = vld [vmem:[#allocation5 + $0x3c0] ss:$16 sps:$4 sm:$0xff]   ;;  %v2777_v0 = vld [vmem:[#allocation5 + $0x3a4] ss:$16 sps:$4 sm:$0xff]  }
  0x4b   :  { %v2772_v1 = vld [vmem:[#allocation5 + $0x1a0] ss:$16 sps:$4 sm:$0xff]   ;;  %v2780_v2 = vld [vmem:[#allocation5 + $0x184] ss:$16 sps:$4 sm:$0xff]  }
  0x4c   :  { %v2775_v3 = vld [vmem:[#allocation5 + $0x3a0] ss:$16 sps:$4 sm:$0xff]   ;;  %v2783_v6 = vld [vmem:[#allocation5 + $0x384] ss:$16 sps:$4 sm:$0xff]  }
  0x4d   :  { %1159 = vmatpush1.bf16.msra.mxu0 %v2718_v29  ;;  %1200 = vmatpush1.bf16.msra.mxu1 %v2721_v31  ;;  %v2778_v5 = vld [vmem:[#allocation5 + $0x180] ss:$16 sps:$4 sm:$0xff]   ;;  %v2786_v8 = vld [vmem:[#allocation5 + $0x164] ss:$16 sps:$4 sm:$0xff]   ;;  %v3316_v29 = vsub.s32 0, %v3295_v4 }
  0x4e   :  { %1160 = vmatprep.subr.bf16.mxu0 %v2726_v30  ;;  %1201 = vmatprep.subr.bf16.mxu1 %v2729_v32  ;;  %v2781_v7 = vld [vmem:[#allocation5 + $0x380] ss:$16 sps:$4 sm:$0xff]   ;;  %v2789_v10 = vld [vmem:[#allocation5 + $0x364] ss:$16 sps:$4 sm:$0xff]  }
  0x4f   :  { %v2784_v9 = vld [vmem:[#allocation5 + $0x160] ss:$16 sps:$4 sm:$0xff]   ;;  %v2792_v12 = vld [vmem:[#allocation5 + $0x144] ss:$16 sps:$4 sm:$0xff]  }
  0x50   :  { %v2787_v11 = vld [vmem:[#allocation5 + $0x360] ss:$16 sps:$4 sm:$0xff]   ;;  %v2795_v14 = vld [vmem:[#allocation5 + $0x344] ss:$16 sps:$4 sm:$0xff]  }
  0x51   :  { %1161 = vmatpush1.bf16.msra.mxu0 %v2724_v33  ;;  %1202 = vmatpush1.bf16.msra.mxu1 %v2727_v35  ;;  %v2790_v13 = vld [vmem:[#allocation5 + $0x140] ss:$16 sps:$4 sm:$0xff]   ;;  %v2798_v16 = vld [vmem:[#allocation5 + $0x124] ss:$16 sps:$4 sm:$0xff]   ;;  %v3322_v33 = vsub.s32 1, %v3295_v4 }
  0x52   :  { %1162 = vmatprep.subr.bf16.mxu0 %v2732_v34  ;;  %1203 = vmatprep.subr.bf16.mxu1 %v2735_v36  ;;  %v2793_v15 = vld [vmem:[#allocation5 + $0x340] ss:$16 sps:$4 sm:$0xff]   ;;  %v2801_v18 = vld [vmem:[#allocation5 + $0x324] ss:$16 sps:$4 sm:$0xff]   ;;  %v3325_v34 = vsub.s32 2, %v3295_v4 }
  0x53   :  { %v2796_v17 = vld [vmem:[#allocation5 + $0x120] ss:$16 sps:$4 sm:$0xff]   ;;  %v2804_v20 = vld [vmem:[#allocation5 + $0x104] ss:$16 sps:$4 sm:$0xff]  }
  0x54   :  { %v2799_v19 = vld [vmem:[#allocation5 + $0x320] ss:$16 sps:$4 sm:$0xff]   ;;  %v2807_v22 = vld [vmem:[#allocation5 + $0x304] ss:$16 sps:$4 sm:$0xff]  }
  0x55   :  { %1163 = vmatpush1.bf16.msra.mxu0 %v2730_v37  ;;  %1204 = vmatpush1.bf16.msra.mxu1 %v2733_v39  ;;  %v2802_v21 = vld [vmem:[#allocation5 + $0x100] ss:$16 sps:$4 sm:$0xff]  }
  0x56   :  { %1164 = vmatprep.subr.bf16.mxu0 %v2738_v38  ;;  %1205 = vmatprep.subr.bf16.mxu1 %v2741_v40  ;;  %v2805_v23 = vld [vmem:[#allocation5 + $0x300] ss:$16 sps:$4 sm:$0xff]   ;;  %v3329_v38 = vsub.s32 3, %v3295_v4 }
  0x57   :  { %v332_v32 = vld [vmem:[%s3381_s4] sm:$0xf] }
  0x58   :  { %v337_v37 = vrot.slane %v332_v32, %v3316_v29 }
  0x59   :  { %1165 = vmatpush1.bf16.msra.mxu0 %v2736_v41  ;;  %1206 = vmatpush1.bf16.msra.mxu1 %v2739_v42  ;;  %v341_v42 = vrot.slane %v332_v32, %v3322_v33 }
  0x5a   :  { %1166 = vmatprep.subr.bf16.mxu0 %v2744_v43  ;;  %1207 = vmatprep.subr.bf16.mxu1 %v2747_v45  ;;  %v345_v43 = vrot.slane %v332_v32, %v3325_v34 }
  0x5d   :  { %1167 = vmatpush1.bf16.msra.mxu0 %v2742_v44  ;;  %1208 = vmatpush1.bf16.msra.mxu1 %v2745_v46 }
  0x5e   :  { %1168 = vmatprep.subr.bf16.mxu0 %v2750_v47  ;;  %1209 = vmatprep.subr.bf16.mxu1 %v2753_v48 }
  0x61   :  { %1169 = vmatpush1.bf16.msra.mxu0 %v2748_v49  ;;  %1210 = vmatpush1.bf16.msra.mxu1 %v2751_v51  ;;  %v349_v49 = vrot.slane %v332_v32, %v3329_v38  ;;  %v2855_v32 = vld [vmem:[#allocation5 + $0x20c] ss:$16 sps:$4 sm:$0xff]  }
  0x62   :  { %1170 = vmatprep.subr.bf16.mxu0 %v2756_v50  ;;  %1211 = vmatprep.subr.bf16.mxu1 %v2759_v52 }
  0x65   :  { %1171 = vmatpush1.bf16.msra.mxu0 %v2754_v53  ;;  %1212 = vmatpush1.bf16.msra.mxu1 %v2757_v55 }
  0x66   :  { %1172 = vmatprep.subr.bf16.mxu0 %v2762_v54  ;;  %1213 = vmatprep.subr.bf16.mxu1 %v2765_v56 }
  0x69   :  { %1173 = vmatpush2.bf16.msra.mxu0 %v2760_v57  ;;  %1214 = vmatpush2.bf16.msra.mxu1 %v2763_v59 }
  0x6a   :  { %1174 = vmatprep.subr.bf16.mxu0 %v2768_v58  ;;  %1215 = vmatprep.subr.bf16.mxu1 %v2771_v60 }
  0x6d   :  { %1175 = vmatpush2.bf16.msra.mxu0 %v2766_v61  ;;  %1216 = vmatpush2.bf16.msra.mxu1 %v2769_v63 }
  0x6e   :  { %1176 = vmatprep.subr.bf16.mxu0 %v2774_v62  ;;  %1217 = vmatprep.subr.bf16.mxu1 %v2777_v0  ;;  %v2808_v0 = vld [vmem:[#allocation5 + $0xe8] ss:$16 sps:$4 sm:$0xff]  }
  0x71   :  { %1177 = vmatpush2.bf16.msra.mxu0 %v2772_v1  ;;  %1218 = vmatpush2.bf16.msra.mxu1 %v2775_v3  ;;  %v2811_v3 = vld [vmem:[#allocation5 + $0x2e8] ss:$16 sps:$4 sm:$0xff]  }
  0x72   :  { %1178 = vmatprep.subr.bf16.mxu0 %v2780_v2  ;;  %1219 = vmatprep.subr.bf16.mxu1 %v2783_v6 }
  0x75   :  { %1179 = vmatpush2.bf16.msra.mxu0 %v2778_v5  ;;  %1220 = vmatpush2.bf16.msra.mxu1 %v2781_v7  ;;  %v2816_v5 = vld [vmem:[#allocation5 + $0xcc] ss:$16 sps:$4 sm:$0xff]  }
  0x76   :  { %1180 = vmatprep.subr.bf16.mxu0 %v2786_v8  ;;  %1221 = vmatprep.subr.bf16.mxu1 %v2789_v10  ;;  %v2819_v7 = vld [vmem:[#allocation5 + $0x2cc] ss:$16 sps:$4 sm:$0xff]   ;;  %v2814_v8 = vld [vmem:[#allocation5 + $0xc8] ss:$16 sps:$4 sm:$0xff]  }
  0x77   :  { %v2817_v10 = vld [vmem:[#allocation5 + $0x2c8] ss:$16 sps:$4 sm:$0xff]  }
  0x79   :  { %1181 = vmatpush2.bf16.msra.mxu0 %v2784_v9  ;;  %1222 = vmatpush2.bf16.msra.mxu1 %v2787_v11  ;;  %v2822_v9 = vld [vmem:[#allocation5 + $0xac] ss:$16 sps:$4 sm:$0xff]  }
  0x7a   :  { %1182 = vmatprep.subr.bf16.mxu0 %v2792_v12  ;;  %1223 = vmatprep.subr.bf16.mxu1 %v2795_v14  ;;  %v2825_v11 = vld [vmem:[#allocation5 + $0x2ac] ss:$16 sps:$4 sm:$0xff]   ;;  %v2820_v12 = vld [vmem:[#allocation5 + $0xa8] ss:$16 sps:$4 sm:$0xff]  }
  0x7b   :  { %v2823_v14 = vld [vmem:[#allocation5 + $0x2a8] ss:$16 sps:$4 sm:$0xff]  }
  0x7d   :  { %1183 = vmatpush2.bf16.msra.mxu0 %v2790_v13  ;;  %1224 = vmatpush2.bf16.msra.mxu1 %v2793_v15  ;;  %v2828_v13 = vld [vmem:[#allocation5 + $0x8c] ss:$16 sps:$4 sm:$0xff]  }
  0x7e   :  { %1184 = vmatprep.subr.bf16.mxu0 %v2798_v16  ;;  %1225 = vmatprep.subr.bf16.mxu1 %v2801_v18  ;;  %v2831_v15 = vld [vmem:[#allocation5 + $0x28c] ss:$16 sps:$4 sm:$0xff]   ;;  %v2826_v16 = vld [vmem:[#allocation5 + $0x88] ss:$16 sps:$4 sm:$0xff]  }
  0x7f   :  { %v2829_v18 = vld [vmem:[#allocation5 + $0x288] ss:$16 sps:$4 sm:$0xff]  }
  0x81   :  { %1185 = vmatpush2.bf16.msra.mxu0 %v2796_v17  ;;  %1226 = vmatpush2.bf16.msra.mxu1 %v2799_v19  ;;  %v2834_v17 = vld [vmem:[#allocation5 + $0x6c] ss:$16 sps:$4 sm:$0xff]  }
  0x82   :  { %1186 = vmatprep.subr.bf16.mxu0 %v2804_v20  ;;  %1227 = vmatprep.subr.bf16.mxu1 %v2807_v22  ;;  %v2837_v19 = vld [vmem:[#allocation5 + $0x26c] ss:$16 sps:$4 sm:$0xff]   ;;  %v2832_v20 = vld [vmem:[#allocation5 + $0x68] ss:$16 sps:$4 sm:$0xff]  }
  0x83   :  { %v2835_v22 = vld [vmem:[#allocation5 + $0x268] ss:$16 sps:$4 sm:$0xff]  }
  0x85   :  { %1187 = vmatpush2.bf16.msra.mxu0 %v2802_v21  ;;  %1228 = vmatpush2.bf16.msra.mxu1 %v2805_v23  ;;  %v2840_v21 = vld [vmem:[#allocation5 + $0x4c] ss:$16 sps:$4 sm:$0xff]  }
  0x86   :  { %1238 = vmatprep.subr.bf16.mxu0 %v2810_v24  ;;  %1279 = vmatprep.subr.bf16.mxu1 %v2813_v25  ;;  %v2843_v23 = vld [vmem:[#allocation5 + $0x24c] ss:$16 sps:$4 sm:$0xff]   ;;  %v2838_v24 = vld [vmem:[#allocation5 + $0x48] ss:$16 sps:$4 sm:$0xff]  }
  0x87   :  { %v2846_v25 = vld [vmem:[#allocation5 + $0x2c] ss:$16 sps:$4 sm:$0xff]  }
 0x100   :  { %v169_v26 = vpop.f32.mrf.mxu0  ;;  %v210_v28 = vpop.f32.mrf.mxu1 }
 0x102   :  { %v171_v27 = vpop.f32.mrf.mxu0  ;;  %v212_v31 = vpop.f32.mrf.mxu1 }
 0x104   :  { %v173_v30 = vpop.f32.mrf.mxu0  ;;  %v214_v36 = vpop.f32.mrf.mxu1 }
 0x105   :  { %v2852_v30 = vld [vmem:[#allocation5 + $0xc] ss:$16 sps:$4 sm:$0xff]  }
 0x106   :  { %v174_v35 = vpop.f32.mrf.mxu0  ;;  %v215_v39 = vpop.f32.mrf.mxu1  ;;  %v2858_v36 = vld [vmem:[#allocation5 + $0x1ec] ss:$16 sps:$4 sm:$0xff]  }
 0x107   :  { %v2850_v35 = vld [vmem:[#allocation5 + $0x8] ss:$16 sps:$4 sm:$0xff]   ;;  %v2861_v39 = vld [vmem:[#allocation5 + $0x3ec] ss:$16 sps:$4 sm:$0xff]  }
 0x108   :  { %v284_v40 = vpop.f32.mrf.mxu0  ;;  %v325_v45 = vpop.f32.mrf.mxu1 }
 0x109   :  { %v285_v41 = vadd.f32 %v284_v40, %v169_v26  ;;  %v326_v48 = vadd.f32 %v325_v45, %v210_v28  ;;  %v2841_v26 = vld [vmem:[#allocation5 + $0x248] ss:$16 sps:$4 sm:$0xff]   ;;  %v2870_v45 = vld [vmem:[#allocation5 + $0x1ac] ss:$16 sps:$4 sm:$0xff]  }
 0x10a   :  { %v286_v44 = vpop.f32.mrf.mxu0  ;;  %v327_v51 = vpop.f32.mrf.mxu1  ;;  %v2844_v28 = vld [vmem:[#allocation5 + $0x28] ss:$16 sps:$4 sm:$0xff]  }
 0x10b   :  { %v354_v46 = vadd.f32 %v337_v37, %v285_v41  ;;  %v287_v47 = vadd.f32 %v286_v44, %v171_v27  ;;  %v356_v53 = vadd.f32 %v345_v43, %v326_v48  ;;  %v328_v54 = vadd.f32 %v327_v51, %v212_v31  ;;  %v2849_v27 = vld [vmem:[#allocation5 + $0x22c] ss:$16 sps:$4 sm:$0xff]   ;;  %v2847_v31 = vld [vmem:[#allocation5 + $0x228] ss:$16 sps:$4 sm:$0xff]  }
 0x10c   :  { %v288_v50 = vpop.f32.mrf.mxu0  ;;  %v329_v57 = vpop.f32.mrf.mxu1  ;;  %v2853_v37 = vld [vmem:[#allocation5 + $0x208] ss:$16 sps:$4 sm:$0xff]   ;;  %v2864_v41 = vld [vmem:[#allocation5 + $0x1cc] ss:$16 sps:$4 sm:$0xff]  }
 0x10d   :  { %v355_v52 = vadd.f32 %v341_v42, %v287_v47  ;;  %v358_v55 = vmax.f32 %v354_v46, 0.0  ;;  %v357_v59 = vadd.f32 %v349_v49, %v328_v54  ;;  %v360_v60 = vmax.f32 %v356_v53, 0.0  ;;  %v2856_v40 = vld [vmem:[#allocation5 + $0x1e8] ss:$16 sps:$4 sm:$0xff]   ;;  %v2867_v43 = vld [vmem:[#allocation5 + $0x3cc] ss:$16 sps:$4 sm:$0xff]  }
 0x10e   :  { %v289_v56 = vpop.f32.mrf.mxu0  ;;  %v330_v61 = vpop.f32.mrf.mxu1  ;;  %v2859_v42 = vld [vmem:[#allocation5 + $0x3e8] ss:$16 sps:$4 sm:$0xff]   ;;  %v2873_v47 = vld [vmem:[#allocation5 + $0x3ac] ss:$16 sps:$4 sm:$0xff]  }
 0x10f   :  { %v359_v58 = vmax.f32 %v355_v52, 0.0  ;;  %v361_v63 = vmax.f32 %v357_v59, 0.0  ;;  %v3334_v1 = vpack.c.bf16 %v358_v55, %v358_v55  ;;  %v3336_v6 = vpack.c.bf16 %v360_v60, %v360_v60  ;;  %v2862_v44 = vld [vmem:[#allocation5 + $0x1c8] ss:$16 sps:$4 sm:$0xff]   ;;  %v2876_v49 = vld [vmem:[#allocation5 + $0x18c] ss:$16 sps:$4 sm:$0xff]  }
 0x110   :  { %v2865_v46 = vld [vmem:[#allocation5 + $0x3c8] ss:$16 sps:$4 sm:$0xff]   ;;  %v2879_v51 = vld [vmem:[#allocation5 + $0x38c] ss:$16 sps:$4 sm:$0xff]  }
 0x111   :  { %v363_v62 = vpack.c.bf16 %v359_v58, %v359_v58  ;;  %v365_v2 = vpack.c.bf16 %v361_v63, %v361_v63  ;;  %v2868_v48 = vld [vmem:[#allocation5 + $0x1a8] ss:$16 sps:$4 sm:$0xff]   ;;  %v2882_v53 = vld [vmem:[#allocation5 + $0x16c] ss:$16 sps:$4 sm:$0xff]  }
 0x112   :  { %v2871_v50 = vld [vmem:[#allocation5 + $0x3a8] ss:$16 sps:$4 sm:$0xff]   ;;  %v2885_v55 = vld [vmem:[#allocation5 + $0x36c] ss:$16 sps:$4 sm:$0xff]  }
 0x113   :  { %1188 = vmatprep.mubr.bf16.mxu0 %v363_v62  ;;  %1229 = vmatprep.mubr.bf16.mxu1 %v365_v2  ;;  %v2874_v52 = vld [vmem:[#allocation5 + $0x188] ss:$16 sps:$4 sm:$0xff]   ;;  %v2888_v57 = vld [vmem:[#allocation5 + $0x14c] ss:$16 sps:$4 sm:$0xff]  }
 0x114   :  { %1189 = vmatmul.mubr.bf16.vlgmr.msra.gmra.mxu0 %v3334_v1  ;;  %1230 = vmatmul.mubr.bf16.vlgmr.msra.gmra.mxu1 %v3336_v6  ;;  %v2877_v54 = vld [vmem:[#allocation5 + $0x388] ss:$16 sps:$4 sm:$0xff]   ;;  %v2891_v59 = vld [vmem:[#allocation5 + $0x34c] ss:$16 sps:$4 sm:$0xff]  }
 0x115   :  { %1239 = vmatpush1.bf16.msra.mxu0 %v2808_v0  ;;  %1270 = vmatprep.mubr.bf16.mxu0 %v363_v62  ;;  %v2880_v56 = vld [vmem:[#allocation5 + $0x168] ss:$16 sps:$4 sm:$0xff]   ;;  %v2894_v61 = vld [vmem:[#allocation5 + $0x12c] ss:$16 sps:$4 sm:$0xff]  }
 0x116   :  { %1280 = vmatpush1.bf16.msra.mxu1 %v2811_v3  ;;  %1240 = vmatprep.subr.bf16.mxu0 %v2816_v5  ;;  %v2883_v58 = vld [vmem:[#allocation5 + $0x368] ss:$16 sps:$4 sm:$0xff]   ;;  %v2897_v63 = vld [vmem:[#allocation5 + $0x32c] ss:$16 sps:$4 sm:$0xff]  }
 0x117   :  { %1311 = vmatprep.mubr.bf16.mxu1 %v365_v2  ;;  %1281 = vmatprep.subr.bf16.mxu1 %v2819_v7  ;;  %v2886_v60 = vld [vmem:[#allocation5 + $0x148] ss:$16 sps:$4 sm:$0xff]   ;;  %v2900_v2 = vld [vmem:[#allocation5 + $0x10c] ss:$16 sps:$4 sm:$0xff]  }
 0x118   :  { %v2889_v62 = vld [vmem:[#allocation5 + $0x348] ss:$16 sps:$4 sm:$0xff]   ;;  %v2903_v5 = vld [vmem:[#allocation5 + $0x30c] ss:$16 sps:$4 sm:$0xff]  }
 0x119   :  { %1241 = vmatpush1.bf16.msra.mxu0 %v2814_v8  ;;  %v2892_v0 = vld [vmem:[#allocation5 + $0x128] ss:$16 sps:$4 sm:$0xff]  }
 0x11a   :  { %1242 = vmatprep.subr.bf16.mxu0 %v2822_v9  ;;  %1282 = vmatpush1.bf16.msra.mxu1 %v2817_v10  ;;  %v2895_v3 = vld [vmem:[#allocation5 + $0x328] ss:$16 sps:$4 sm:$0xff]   ;;  %v2904_v10 = vld [vmem:[#allocation8 + $0xe0] ss:$16 sps:$4 sm:$0xff]  }
 0x11b   :  { %1283 = vmatprep.subr.bf16.mxu1 %v2825_v11  ;;  %v2898_v7 = vld [vmem:[#allocation5 + $0x108] ss:$16 sps:$4 sm:$0xff]  }
 0x11c   :  { %v2906_v8 = vld [vmem:[#allocation8 + $0xe4] ss:$16 sps:$4 sm:$0xff]  }
 0x11d   :  { %1243 = vmatpush1.bf16.msra.mxu0 %v2820_v12  ;;  %v2901_v9 = vld [vmem:[#allocation5 + $0x308] ss:$16 sps:$4 sm:$0xff]   ;;  %v2907_v12 = vld [vmem:[#allocation8 + $0xc0] ss:$16 sps:$4 sm:$0xff]  }
 0x11e   :  { %1244 = vmatprep.subr.bf16.mxu0 %v2828_v13  ;;  %1284 = vmatpush1.bf16.msra.mxu1 %v2823_v14  ;;  %v2909_v11 = vld [vmem:[#allocation8 + $0xc4] ss:$16 sps:$4 sm:$0xff]   ;;  %v2910_v14 = vld [vmem:[#allocation8 + $0xa0] ss:$16 sps:$4 sm:$0xff]  }
 0x11f   :  { %1285 = vmatprep.subr.bf16.mxu1 %v2831_v15  ;;  %v2912_v13 = vld [vmem:[#allocation8 + $0xa4] ss:$16 sps:$4 sm:$0xff]  }
 0x120   :  { %v2915_v15 = vld [vmem:[#allocation8 + $0x84] ss:$16 sps:$4 sm:$0xff]  }
 0x121   :  { %1245 = vmatpush1.bf16.msra.mxu0 %v2826_v16  ;;  %v2913_v16 = vld [vmem:[#allocation8 + $0x80] ss:$16 sps:$4 sm:$0xff]  }
 0x122   :  { %1246 = vmatprep.subr.bf16.mxu0 %v2834_v17  ;;  %1286 = vmatpush1.bf16.msra.mxu1 %v2829_v18  ;;  %v2952_v17 = vld [vmem:[#allocation8 + $0x2e0] ss:$16 sps:$4 sm:$0xff]   ;;  %v2954_v18 = vld [vmem:[#allocation8 + $0x2e4] ss:$16 sps:$4 sm:$0xff]  }
 0x123   :  { %1287 = vmatprep.subr.bf16.mxu1 %v2837_v19  ;;  %v2918_v19 = vld [vmem:[#allocation8 + $0x64] ss:$16 sps:$4 sm:$0xff]  }
 0x125   :  { %1247 = vmatpush1.bf16.msra.mxu0 %v2832_v20  ;;  %v2958_v20 = vld [vmem:[#allocation8 + $0x2c0] ss:$16 sps:$4 sm:$0xff]  }
 0x126   :  { %1248 = vmatprep.subr.bf16.mxu0 %v2840_v21  ;;  %1288 = vmatpush1.bf16.msra.mxu1 %v2835_v22  ;;  %v2960_v21 = vld [vmem:[#allocation8 + $0x2c4] ss:$16 sps:$4 sm:$0xff]   ;;  %v2919_v22 = vld [vmem:[#allocation8 + $0x40] ss:$16 sps:$4 sm:$0xff]  }
 0x127   :  { %1289 = vmatprep.subr.bf16.mxu1 %v2843_v23  ;;  %v2964_v23 = vld [vmem:[#allocation8 + $0x2a0] ss:$16 sps:$4 sm:$0xff]  }
 0x129   :  { %1249 = vmatpush1.bf16.msra.mxu0 %v2838_v24  ;;  %v2966_v24 = vld [vmem:[#allocation8 + $0x2a4] ss:$16 sps:$4 sm:$0xff]  }
 0x12a   :  { %1250 = vmatprep.subr.bf16.mxu0 %v2846_v25  ;;  %1290 = vmatpush1.bf16.msra.mxu1 %v2841_v26  ;;  %v2924_v25 = vld [vmem:[#allocation8 + $0x24] ss:$16 sps:$4 sm:$0xff]   ;;  %v2922_v26 = vld [vmem:[#allocation8 + $0x20] ss:$16 sps:$4 sm:$0xff]  }
 0x12b   :  { %1291 = vmatprep.subr.bf16.mxu1 %v2849_v27  ;;  %v2970_v27 = vld [vmem:[#allocation8 + $0x280] ss:$16 sps:$4 sm:$0xff]  }
 0x12d   :  { %1251 = vmatpush1.bf16.msra.mxu0 %v2844_v28  ;;  %v2972_v28 = vld [vmem:[#allocation8 + $0x284] ss:$16 sps:$4 sm:$0xff]  }
 0x12e   :  { %1252 = vmatprep.subr.bf16.mxu0 %v2852_v30  ;;  %1292 = vmatpush1.bf16.msra.mxu1 %v2847_v31  ;;  %v2927_v30 = vld [vmem:[#allocation8 + $0x4] ss:$16 sps:$4 sm:$0xff]   ;;  %v2925_v31 = vld [vmem:[#allocation8] ss:$16 sps:$4 sm:$0xff]  }
 0x12f   :  { %1293 = vmatprep.subr.bf16.mxu1 %v2855_v32  ;;  %v2976_v32 = vld [vmem:[#allocation8 + $0x260] ss:$16 sps:$4 sm:$0xff]  }
 0x131   :  { %1253 = vmatpush1.bf16.msra.mxu0 %v2850_v35  ;;  %v2978_v35 = vld [vmem:[#allocation8 + $0x264] ss:$16 sps:$4 sm:$0xff]  }
 0x132   :  { %1254 = vmatprep.subr.bf16.mxu0 %v2858_v36  ;;  %1294 = vmatpush1.bf16.msra.mxu1 %v2853_v37  ;;  %v2930_v36 = vld [vmem:[#allocation8 + $0x1e4] ss:$16 sps:$4 sm:$0xff]   ;;  %v2928_v37 = vld [vmem:[#allocation8 + $0x1e0] ss:$16 sps:$4 sm:$0xff]  }
 0x133   :  { %1295 = vmatprep.subr.bf16.mxu1 %v2861_v39  ;;  %v2982_v39 = vld [vmem:[#allocation8 + $0x240] ss:$16 sps:$4 sm:$0xff]  }
 0x135   :  { %1255 = vmatpush2.bf16.msra.mxu0 %v2856_v40  ;;  %v2984_v40 = vld [vmem:[#allocation8 + $0x244] ss:$16 sps:$4 sm:$0xff]  }
 0x136   :  { %1256 = vmatprep.subr.bf16.mxu0 %v2864_v41  ;;  %1296 = vmatpush2.bf16.msra.mxu1 %v2859_v42  ;;  %v2933_v41 = vld [vmem:[#allocation8 + $0x1c4] ss:$16 sps:$4 sm:$0xff]   ;;  %v2931_v42 = vld [vmem:[#allocation8 + $0x1c0] ss:$16 sps:$4 sm:$0xff]  }
 0x137   :  { %1297 = vmatprep.subr.bf16.mxu1 %v2867_v43  ;;  %v2988_v43 = vld [vmem:[#allocation8 + $0x220] ss:$16 sps:$4 sm:$0xff]  }
 0x139   :  { %1257 = vmatpush2.bf16.msra.mxu0 %v2862_v44  ;;  %v2990_v44 = vld [vmem:[#allocation8 + $0x224] ss:$16 sps:$4 sm:$0xff]  }
 0x13a   :  { %1258 = vmatprep.subr.bf16.mxu0 %v2870_v45  ;;  %1298 = vmatpush2.bf16.msra.mxu1 %v2865_v46  ;;  %v2936_v45 = vld [vmem:[#allocation8 + $0x1a4] ss:$16 sps:$4 sm:$0xff]   ;;  %v2934_v46 = vld [vmem:[#allocation8 + $0x1a0] ss:$16 sps:$4 sm:$0xff]  }
 0x13b   :  { %1299 = vmatprep.subr.bf16.mxu1 %v2873_v47  ;;  %v2994_v47 = vld [vmem:[#allocation8 + $0x200] ss:$16 sps:$4 sm:$0xff]  }
 0x13d   :  { %1259 = vmatpush2.bf16.msra.mxu0 %v2868_v48  ;;  %v2996_v48 = vld [vmem:[#allocation8 + $0x204] ss:$16 sps:$4 sm:$0xff]  }
 0x13e   :  { %1260 = vmatprep.subr.bf16.mxu0 %v2876_v49  ;;  %1300 = vmatpush2.bf16.msra.mxu1 %v2871_v50  ;;  %v2939_v49 = vld [vmem:[#allocation8 + $0x184] ss:$16 sps:$4 sm:$0xff]   ;;  %v2937_v50 = vld [vmem:[#allocation8 + $0x180] ss:$16 sps:$4 sm:$0xff]  }
 0x13f   :  { %1301 = vmatprep.subr.bf16.mxu1 %v2879_v51  ;;  %v3000_v51 = vld [vmem:[#allocation8 + $0x3e0] ss:$16 sps:$4 sm:$0xff]  }
 0x141   :  { %1261 = vmatpush2.bf16.msra.mxu0 %v2874_v52  ;;  %v3002_v52 = vld [vmem:[#allocation8 + $0x3e4] ss:$16 sps:$4 sm:$0xff]  }
 0x142   :  { %1262 = vmatprep.subr.bf16.mxu0 %v2882_v53  ;;  %1302 = vmatpush2.bf16.msra.mxu1 %v2877_v54  ;;  %v2942_v53 = vld [vmem:[#allocation8 + $0x164] ss:$16 sps:$4 sm:$0xff]   ;;  %v2940_v54 = vld [vmem:[#allocation8 + $0x160] ss:$16 sps:$4 sm:$0xff]  }
 0x143   :  { %1303 = vmatprep.subr.bf16.mxu1 %v2885_v55  ;;  %v3006_v55 = vld [vmem:[#allocation8 + $0x3c0] ss:$16 sps:$4 sm:$0xff]  }
 0x145   :  { %1263 = vmatpush2.bf16.msra.mxu0 %v2880_v56  ;;  %v3008_v56 = vld [vmem:[#allocation8 + $0x3c4] ss:$16 sps:$4 sm:$0xff]  }
 0x146   :  { %1264 = vmatprep.subr.bf16.mxu0 %v2888_v57  ;;  %1304 = vmatpush2.bf16.msra.mxu1 %v2883_v58  ;;  %v2945_v57 = vld [vmem:[#allocation8 + $0x144] ss:$16 sps:$4 sm:$0xff]   ;;  %v2943_v58 = vld [vmem:[#allocation8 + $0x140] ss:$16 sps:$4 sm:$0xff]  }
 0x147   :  { %1305 = vmatprep.subr.bf16.mxu1 %v2891_v59  ;;  %v3012_v59 = vld [vmem:[#allocation8 + $0x3a0] ss:$16 sps:$4 sm:$0xff]  }
 0x149   :  { %1265 = vmatpush2.bf16.msra.mxu0 %v2886_v60  ;;  %v3014_v60 = vld [vmem:[#allocation8 + $0x3a4] ss:$16 sps:$4 sm:$0xff]  }
 0x14a   :  { %1266 = vmatprep.subr.bf16.mxu0 %v2894_v61  ;;  %1306 = vmatpush2.bf16.msra.mxu1 %v2889_v62  ;;  %v2948_v61 = vld [vmem:[#allocation8 + $0x124] ss:$16 sps:$4 sm:$0xff]   ;;  %v2946_v62 = vld [vmem:[#allocation8 + $0x120] ss:$16 sps:$4 sm:$0xff]  }
 0x14b   :  { %1307 = vmatprep.subr.bf16.mxu1 %v2897_v63  ;;  %v3018_v63 = vld [vmem:[#allocation8 + $0x380] ss:$16 sps:$4 sm:$0xff]  }
 0x14d   :  { %1267 = vmatpush2.bf16.msra.mxu0 %v2892_v0  ;;  %v3020_v0 = vld [vmem:[#allocation8 + $0x384] ss:$16 sps:$4 sm:$0xff]  }
 0x14e   :  { %1268 = vmatprep.subr.bf16.mxu0 %v2900_v2  ;;  %1308 = vmatpush2.bf16.msra.mxu1 %v2895_v3  ;;  %v2951_v2 = vld [vmem:[#allocation8 + $0x104] ss:$16 sps:$4 sm:$0xff]   ;;  %v2949_v3 = vld [vmem:[#allocation8 + $0x100] ss:$16 sps:$4 sm:$0xff]  }
 0x14f   :  { %1309 = vmatprep.subr.bf16.mxu1 %v2903_v5  ;;  %v3024_v5 = vld [vmem:[#allocation8 + $0x360] ss:$16 sps:$4 sm:$0xff]  }
 0x151   :  { %1269 = vmatpush2.bf16.msra.mxu0 %v2898_v7  ;;  %v3026_v7 = vld [vmem:[#allocation8 + $0x364] ss:$16 sps:$4 sm:$0xff]  }
 0x152   :  { %2118 = vmatprep.subr.bf16.mxu0 %v2906_v8  ;;  %1310 = vmatpush2.bf16.msra.mxu1 %v2901_v9  ;;  %v2957_v8 = vld [vmem:[#allocation8 + $0xec] ss:$16 sps:$4 sm:$0xff]   ;;  %v3030_v9 = vld [vmem:[#allocation8 + $0x340] ss:$16 sps:$4 sm:$0xff]  }
 0x153   :  { %2159 = vmatprep.subr.bf16.mxu1 %v2954_v18 }
 0x154   :  { %1271 = vmatmul.mubr.bf16.vlgmr.msra.gmra.mxu0 %v3334_v1  ;;  %v2916_v1 = vld [vmem:[#allocation8 + $0x60] ss:$16 sps:$4 sm:$0xff]  }
 0x155   :  { %2119 = vmatpush1.bf16.msra.mxu0 %v2904_v10  ;;  %1312 = vmatmul.mubr.bf16.vlgmr.msra.gmra.mxu1 %v3336_v6  ;;  %v2921_v6 = vld [vmem:[#allocation8 + $0x44] ss:$16 sps:$4 sm:$0xff]  }
 0x156   :  { %2120 = vmatprep.subr.bf16.mxu0 %v2909_v11  ;;  %2160 = vmatpush1.bf16.msra.mxu1 %v2952_v17  ;;  %v3032_v10 = vld [vmem:[#allocation8 + $0x344] ss:$16 sps:$4 sm:$0xff]  }
 0x157   :  { %2161 = vmatprep.subr.bf16.mxu1 %v2960_v21  ;;  %v3038_v11 = vld [vmem:[#allocation8 + $0x324] ss:$16 sps:$4 sm:$0xff]  }
 0x159   :  { %2121 = vmatpush1.bf16.msra.mxu0 %v2907_v12  ;;  %v3036_v12 = vld [vmem:[#allocation8 + $0x320] ss:$16 sps:$4 sm:$0xff]  }
 0x15a   :  { %2122 = vmatprep.subr.bf16.mxu0 %v2912_v13  ;;  %2162 = vmatpush1.bf16.msra.mxu1 %v2958_v20  ;;  %v3044_v13 = vld [vmem:[#allocation8 + $0x304] ss:$16 sps:$4 sm:$0xff]  }
 0x15b   :  { %2163 = vmatprep.subr.bf16.mxu1 %v2966_v24 }
 0x15d   :  { %2123 = vmatpush1.bf16.msra.mxu0 %v2910_v14  ;;  %v3042_v14 = vld [vmem:[#allocation8 + $0x300] ss:$16 sps:$4 sm:$0xff]  }
 0x15e   :  { %2124 = vmatprep.subr.bf16.mxu0 %v2915_v15  ;;  %2164 = vmatpush1.bf16.msra.mxu1 %v2964_v23  ;;  %v3050_v15 = vld [vmem:[#allocation8 + $0x2ec] ss:$16 sps:$4 sm:$0xff]  }
 0x15f   :  { %2165 = vmatprep.subr.bf16.mxu1 %v2972_v28 }
 0x161   :  { %2125 = vmatpush1.bf16.msra.mxu0 %v2913_v16  ;;  %v3342_v16 = vld [vmem:[#allocation7] sm:$0xf] }
 0x162   :  { %2126 = vmatprep.subr.bf16.mxu0 %v2918_v19  ;;  %2166 = vmatpush1.bf16.msra.mxu1 %v2970_v27  ;;  %v499_v17 = vrot.slane %v3342_v16, %v3316_v29  ;;  %v503_v18 = vrot.slane %v3342_v16, %v3322_v33 }
 0x163   :  { %2167 = vmatprep.subr.bf16.mxu1 %v2978_v35  ;;  %v2955_v35 = vld [vmem:[#allocation8 + $0xe8] ss:$16 sps:$4 sm:$0xff]  }
 0x165   :  { %2127 = vmatpush1.bf16.msra.mxu0 %v2916_v1 }
 0x166   :  { %2128 = vmatprep.subr.bf16.mxu0 %v2921_v6  ;;  %2168 = vmatpush1.bf16.msra.mxu1 %v2976_v32 }
 0x167   :  { %2169 = vmatprep.subr.bf16.mxu1 %v2984_v40  ;;  %v2969_v40 = vld [vmem:[#allocation8 + $0xac] ss:$16 sps:$4 sm:$0xff]  }
 0x169   :  { %2129 = vmatpush1.bf16.msra.mxu0 %v2919_v22 }
 0x16a   :  { %2130 = vmatprep.subr.bf16.mxu0 %v2924_v25  ;;  %2170 = vmatpush1.bf16.msra.mxu1 %v2982_v39  ;;  %v2961_v39 = vld [vmem:[#allocation8 + $0xc8] ss:$16 sps:$4 sm:$0xff]  }
 0x16b   :  { %2171 = vmatprep.subr.bf16.mxu1 %v2990_v44  ;;  %v2981_v44 = vld [vmem:[#allocation8 + $0x6c] ss:$16 sps:$4 sm:$0xff]  }
 0x16d   :  { %2131 = vmatpush1.bf16.msra.mxu0 %v2922_v26 }
 0x16e   :  { %2132 = vmatprep.subr.bf16.mxu0 %v2927_v30  ;;  %2172 = vmatpush1.bf16.msra.mxu1 %v2988_v43  ;;  %v2973_v43 = vld [vmem:[#allocation8 + $0x88] ss:$16 sps:$4 sm:$0xff]  }
 0x16f   :  { %2173 = vmatprep.subr.bf16.mxu1 %v2996_v48  ;;  %v2993_v48 = vld [vmem:[#allocation8 + $0x2c] ss:$16 sps:$4 sm:$0xff]  }
 0x171   :  { %2133 = vmatpush1.bf16.msra.mxu0 %v2925_v31 }
 0x172   :  { %2134 = vmatprep.subr.bf16.mxu0 %v2930_v36  ;;  %2174 = vmatpush1.bf16.msra.mxu1 %v2994_v47  ;;  %v2985_v47 = vld [vmem:[#allocation8 + $0x48] ss:$16 sps:$4 sm:$0xff]  }
 0x173   :  { %2175 = vmatprep.subr.bf16.mxu1 %v3002_v52  ;;  %v3005_v52 = vld [vmem:[#allocation8 + $0x1ec] ss:$16 sps:$4 sm:$0xff]  }
 0x175   :  { %2135 = vmatpush2.bf16.msra.mxu0 %v2928_v37  ;;  %v2963_v37 = vld [vmem:[#allocation8 + $0xcc] ss:$16 sps:$4 sm:$0xff]  }
 0x176   :  { %2136 = vmatprep.subr.bf16.mxu0 %v2933_v41  ;;  %2176 = vmatpush2.bf16.msra.mxu1 %v3000_v51  ;;  %v2967_v41 = vld [vmem:[#allocation8 + $0xa8] ss:$16 sps:$4 sm:$0xff]  }
 0x177   :  { %2177 = vmatprep.subr.bf16.mxu1 %v3008_v56  ;;  %v2997_v51 = vld [vmem:[#allocation8 + $0x8] ss:$16 sps:$4 sm:$0xff]   ;;  %v3017_v56 = vld [vmem:[#allocation8 + $0x1ac] ss:$16 sps:$4 sm:$0xff]  }
 0x179   :  { %2137 = vmatpush2.bf16.msra.mxu0 %v2931_v42  ;;  %v2975_v42 = vld [vmem:[#allocation8 + $0x8c] ss:$16 sps:$4 sm:$0xff]  }
 0x17a   :  { %2138 = vmatprep.subr.bf16.mxu0 %v2936_v45  ;;  %2178 = vmatpush2.bf16.msra.mxu1 %v3006_v55  ;;  %v2979_v45 = vld [vmem:[#allocation8 + $0x68] ss:$16 sps:$4 sm:$0xff]  }
 0x17b   :  { %2179 = vmatprep.subr.bf16.mxu1 %v3014_v60  ;;  %v3009_v55 = vld [vmem:[#allocation8 + $0x1c8] ss:$16 sps:$4 sm:$0xff]   ;;  %v3029_v60 = vld [vmem:[#allocation8 + $0x16c] ss:$16 sps:$4 sm:$0xff]  }
 0x17d   :  { %2139 = vmatpush2.bf16.msra.mxu0 %v2934_v46  ;;  %v2987_v46 = vld [vmem:[#allocation8 + $0x4c] ss:$16 sps:$4 sm:$0xff]  }
 0x17e   :  { %2140 = vmatprep.subr.bf16.mxu0 %v2939_v49  ;;  %2180 = vmatpush2.bf16.msra.mxu1 %v3012_v59  ;;  %v2991_v49 = vld [vmem:[#allocation8 + $0x28] ss:$16 sps:$4 sm:$0xff]  }
 0x17f   :  { %2181 = vmatprep.subr.bf16.mxu1 %v3020_v0  ;;  %v3021_v59 = vld [vmem:[#allocation8 + $0x188] ss:$16 sps:$4 sm:$0xff]  }
 0x180   :  { %v3033_v0 = vld [vmem:[#allocation8 + $0x148] ss:$16 sps:$4 sm:$0xff]  }
 0x181   :  { %2141 = vmatpush2.bf16.msra.mxu0 %v2937_v50  ;;  %v2999_v50 = vld [vmem:[#allocation8 + $0xc] ss:$16 sps:$4 sm:$0xff]  }
 0x182   :  { %2142 = vmatprep.subr.bf16.mxu0 %v2942_v53  ;;  %2182 = vmatpush2.bf16.msra.mxu1 %v3018_v63  ;;  %v3003_v53 = vld [vmem:[#allocation8 + $0x1e8] ss:$16 sps:$4 sm:$0xff]   ;;  %v507_v63 = vrot.slane %v3342_v16, %v3325_v34 }
 0x183   :  { %2183 = vmatprep.subr.bf16.mxu1 %v3026_v7 }
 0x185   :  { %2143 = vmatpush2.bf16.msra.mxu0 %v2940_v54  ;;  %v3011_v54 = vld [vmem:[#allocation8 + $0x1cc] ss:$16 sps:$4 sm:$0xff]  }
 0x186   :  { %2144 = vmatprep.subr.bf16.mxu0 %v2945_v57  ;;  %2184 = vmatpush2.bf16.msra.mxu1 %v3024_v5  ;;  %v3015_v57 = vld [vmem:[#allocation8 + $0x1a8] ss:$16 sps:$4 sm:$0xff]  }
 0x187   :  { %2185 = vmatprep.subr.bf16.mxu1 %v3032_v10 }
 0x189   :  { %2145 = vmatpush2.bf16.msra.mxu0 %v2943_v58  ;;  %v3023_v58 = vld [vmem:[#allocation8 + $0x18c] ss:$16 sps:$4 sm:$0xff]  }
 0x18a   :  { %2146 = vmatprep.subr.bf16.mxu0 %v2948_v61  ;;  %2186 = vmatpush2.bf16.msra.mxu1 %v3030_v9  ;;  %v3027_v61 = vld [vmem:[#allocation8 + $0x168] ss:$16 sps:$4 sm:$0xff]  }
 0x18b   :  { %2187 = vmatprep.subr.bf16.mxu1 %v3038_v11  ;;  %v3047_v11 = vld [vmem:[#allocation8 + $0x10c] ss:$16 sps:$4 sm:$0xff]  }
 0x18d   :  { %2147 = vmatpush2.bf16.msra.mxu0 %v2946_v62  ;;  %v3035_v62 = vld [vmem:[#allocation8 + $0x14c] ss:$16 sps:$4 sm:$0xff]  }
 0x18e   :  { %2148 = vmatprep.subr.bf16.mxu0 %v2951_v2  ;;  %2188 = vmatpush2.bf16.msra.mxu1 %v3036_v12  ;;  %v3041_v2 = vld [vmem:[#allocation8 + $0x12c] ss:$16 sps:$4 sm:$0xff]  }
 0x18f   :  { %2189 = vmatprep.subr.bf16.mxu1 %v3044_v13 }
 0x191   :  { %2149 = vmatpush2.bf16.msra.mxu0 %v2949_v3  ;;  %v511_v3 = vrot.slane %v3342_v16, %v3329_v38 }
 0x192   :  { %2200 = vmatprep.subr.bf16.mxu0 %v2957_v8  ;;  %2190 = vmatpush2.bf16.msra.mxu1 %v3042_v14  ;;  %v3039_v8 = vld [vmem:[#allocation8 + $0x128] ss:$16 sps:$4 sm:$0xff]  }
 0x193   :  { %2241 = vmatprep.subr.bf16.mxu1 %v3050_v15 }
 0x1d4   :  { %v1190_v19 = vpop.f32.mrf.mxu0  ;;  %v1231_v21 = vpop.f32.mrf.mxu1 }
 0x1d5   :  { %v1191_v1 = vadd.f32 %v1190_v19, %v499_v17 }
 0x1d6   :  { %v1192_v20 = vpop.f32.mrf.mxu0  ;;  %v1233_v24 = vpop.f32.mrf.mxu1 }
 0x1d7   :  { %v1193_v6 = vadd.f32 %v1192_v20, %v503_v18  ;;  %v1232_v22 = vadd.f32 %v1231_v21, %v1191_v1  ;;  %v3045_v18 = vld [vmem:[#allocation8 + $0x108] ss:$16 sps:$4 sm:$0xff]  }
 0x1d8   :  { %v1194_v23 = vpop.f32.mrf.mxu0  ;;  %v1235_v28 = vpop.f32.mrf.mxu1 }
 0x1d9   :  { %v1234_v25 = vadd.f32 %v1233_v24, %v1193_v6  ;;  %v1320_v26 = vmax.f32 %v1232_v22, 0.0  ;;  %v3048_v22 = vld [vmem:[#allocation8 + $0x2e8] ss:$16 sps:$4 sm:$0xff]   ;;  %v3053_v24 = vld [vmem:[#allocation8 + $0x2cc] ss:$16 sps:$4 sm:$0xff]  }
 0x1da   :  { %v1195_v27 = vpop.f32.mrf.mxu0  ;;  %v1236_v31 = vpop.f32.mrf.mxu1  ;;  %v3059_v28 = vld [vmem:[#allocation8 + $0x28c] ss:$16 sps:$4 sm:$0xff]  }
 0x1db   :  { %v1321_v30 = vmax.f32 %v1234_v25, 0.0  ;;  %v3348_v36 = vpack.c.bf16 %v1320_v26, %v1320_v26  ;;  %v3051_v25 = vld [vmem:[#allocation8 + $0x2c8] ss:$16 sps:$4 sm:$0xff]   ;;  %v3056_v26 = vld [vmem:[#allocation8 + $0x2ac] ss:$16 sps:$4 sm:$0xff]  }
 0x1dc   :  { %v3054_v27 = vld [vmem:[#allocation8 + $0x2a8] ss:$16 sps:$4 sm:$0xff]   ;;  %v3062_v31 = vld [vmem:[#allocation8 + $0x26c] ss:$16 sps:$4 sm:$0xff]  }
 0x1dd   :  { %v1325_v32 = vpack.c.bf16 %v1321_v30, %v1321_v30  ;;  %v3057_v30 = vld [vmem:[#allocation8 + $0x288] ss:$16 sps:$4 sm:$0xff]  }
 0x1df   :  { %2150 = vmatprep.mubr.bf16.mxu0 %v1325_v32 }
 0x1e0   :  { %2151 = vmatmul.mubr.bf16.vlgmr.msra.gmra.mxu0 %v3348_v36 }
 0x1e1   :  { %2201 = vmatpush1.bf16.msra.mxu0 %v2955_v35  ;;  %2232 = vmatprep.mubr.bf16.mxu0 %v1325_v32  ;;  %v3060_v32 = vld [vmem:[#allocation8 + $0x268] ss:$16 sps:$4 sm:$0xff]   ;;  %v3065_v35 = vld [vmem:[#allocation8 + $0x24c] ss:$16 sps:$4 sm:$0xff]  }
 0x1e2   :  { %2202 = vmatprep.subr.bf16.mxu0 %v2963_v37  ;;  %v3063_v37 = vld [vmem:[#allocation8 + $0x248] ss:$16 sps:$4 sm:$0xff]  }
 0x1e5   :  { %2203 = vmatpush1.bf16.msra.mxu0 %v2961_v39  ;;  %v3066_v39 = vld [vmem:[#allocation8 + $0x228] ss:$16 sps:$4 sm:$0xff]  }
 0x1e6   :  { %2204 = vmatprep.subr.bf16.mxu0 %v2969_v40  ;;  %v3071_v40 = vld [vmem:[#allocation8 + $0x20c] ss:$16 sps:$4 sm:$0xff]  }
 0x1e9   :  { %2205 = vmatpush1.bf16.msra.mxu0 %v2967_v41  ;;  %v3069_v41 = vld [vmem:[#allocation8 + $0x208] ss:$16 sps:$4 sm:$0xff]  }
 0x1ea   :  { %2206 = vmatprep.subr.bf16.mxu0 %v2975_v42  ;;  %v3074_v42 = vld [vmem:[#allocation8 + $0x3ec] ss:$16 sps:$4 sm:$0xff]  }
 0x1ed   :  { %2207 = vmatpush1.bf16.msra.mxu0 %v2973_v43  ;;  %v3072_v43 = vld [vmem:[#allocation8 + $0x3e8] ss:$16 sps:$4 sm:$0xff]  }
 0x1ee   :  { %2208 = vmatprep.subr.bf16.mxu0 %v2981_v44  ;;  %v3077_v44 = vld [vmem:[#allocation8 + $0x3cc] ss:$16 sps:$4 sm:$0xff]  }
 0x1f1   :  { %2209 = vmatpush1.bf16.msra.mxu0 %v2979_v45  ;;  %v3075_v45 = vld [vmem:[#allocation8 + $0x3c8] ss:$16 sps:$4 sm:$0xff]  }
 0x1f2   :  { %2210 = vmatprep.subr.bf16.mxu0 %v2987_v46  ;;  %v3080_v46 = vld [vmem:[#allocation8 + $0x3ac] ss:$16 sps:$4 sm:$0xff]  }
 0x1f5   :  { %2211 = vmatpush1.bf16.msra.mxu0 %v2985_v47  ;;  %v3078_v47 = vld [vmem:[#allocation8 + $0x3a8] ss:$16 sps:$4 sm:$0xff]  }
 0x1f6   :  { %2212 = vmatprep.subr.bf16.mxu0 %v2993_v48  ;;  %v3083_v48 = vld [vmem:[#allocation8 + $0x38c] ss:$16 sps:$4 sm:$0xff]  }
 0x1f9   :  { %2213 = vmatpush1.bf16.msra.mxu0 %v2991_v49  ;;  %v3081_v49 = vld [vmem:[#allocation8 + $0x388] ss:$16 sps:$4 sm:$0xff]  }
 0x1fa   :  { %2214 = vmatprep.subr.bf16.mxu0 %v2999_v50  ;;  %v3086_v50 = vld [vmem:[#allocation8 + $0x36c] ss:$16 sps:$4 sm:$0xff]  }
 0x1fd   :  { %2215 = vmatpush1.bf16.msra.mxu0 %v2997_v51  ;;  %v3084_v51 = vld [vmem:[#allocation8 + $0x368] ss:$16 sps:$4 sm:$0xff]  }
 0x1fe   :  { %2216 = vmatprep.subr.bf16.mxu0 %v3005_v52  ;;  %v3089_v52 = vld [vmem:[#allocation8 + $0x34c] ss:$16 sps:$4 sm:$0xff]  }
 0x201   :  { %2217 = vmatpush2.bf16.msra.mxu0 %v3003_v53  ;;  %v3087_v53 = vld [vmem:[#allocation8 + $0x348] ss:$16 sps:$4 sm:$0xff]  }
 0x202   :  { %2218 = vmatprep.subr.bf16.mxu0 %v3011_v54  ;;  %v3092_v54 = vld [vmem:[#allocation8 + $0x32c] ss:$16 sps:$4 sm:$0xff]  }
 0x205   :  { %2219 = vmatpush2.bf16.msra.mxu0 %v3009_v55  ;;  %v3090_v55 = vld [vmem:[#allocation8 + $0x328] ss:$16 sps:$4 sm:$0xff]  }
 0x206   :  { %2220 = vmatprep.subr.bf16.mxu0 %v3017_v56  ;;  %v3095_v56 = vld [vmem:[#allocation8 + $0x30c] ss:$16 sps:$4 sm:$0xff]  }
 0x209   :  { %2221 = vmatpush2.bf16.msra.mxu0 %v3015_v57  ;;  %v3093_v57 = vld [vmem:[#allocation8 + $0x308] ss:$16 sps:$4 sm:$0xff]  }
 0x20a   :  { %2222 = vmatprep.subr.bf16.mxu0 %v3023_v58 }
 0x20d   :  { %2223 = vmatpush2.bf16.msra.mxu0 %v3021_v59 }
 0x20e   :  { %2224 = vmatprep.subr.bf16.mxu0 %v3029_v60  ;;  %v3212_v60 = vmov 1966171168  }
 0x211   :  { %2225 = vmatpush2.bf16.msra.mxu0 %v3027_v61  ;;  %v2307_v61 = vunpack.c.l.s4 %v3212_v60 }
 0x212   :  { %2226 = vmatprep.subr.bf16.mxu0 %v3035_v62 }
 0x214   :  { %v1272_v5 = vpop.f32.mrf.mxu0 }
 0x215   :  { %v1273_v7 = vadd.f32 %v1272_v5, %v507_v63  ;;  %2227 = vmatpush2.bf16.msra.mxu0 %v3033_v0  ;;  %v1313_v10 = vpop.f32.mrf.mxu1  ;;  %v2308_v63 = vunpack.c.0.s8 %v2307_v61  ;;  %v2693_v0 = vld.sshfl [vmem:[%s3386_s9] sm:$0x33 pattern:$0x75316420] }
 0x216   :  { %v1274_v9 = vpop.f32.mrf.mxu0  ;;  %2228 = vmatprep.subr.bf16.mxu0 %v3041_v2 }
 0x217   :  { %v1275_v12 = vadd.f32 %v1274_v9, %v511_v3  ;;  %v1314_v13 = vadd.f32 %v1313_v10, %v1273_v7  ;;  %v1315_v15 = vpop.f32.mrf.mxu1  ;;  %v2305_v3 = vcombine.high %v2693_v0, %v2693_v0  ;;  %v2311_v5 = vsub.s32 %v2308_v63, %v3295_v4  ;;  %v2291_v10 = vld [vmem:[%s3387_s10] sm:$0x3] }
 0x218   :  { %v1276_v14 = vpop.f32.mrf.mxu0  ;;  %2294 = vperm.xlu0 %2704, %v2291_v10  }
 0x219   :  { %v1316_v17 = vadd.f32 %v1315_v15, %v1275_v12  ;;  %2229 = vmatpush2.bf16.msra.mxu0 %v3039_v8  ;;  %v1322_v19 = vmax.f32 %v1314_v13, 0.0  ;;  %v1317_v20 = vpop.f32.mrf.mxu1  ;;  %v2319_v7 = vrot.slane %v2305_v3, %v2311_v5  ;;  %v2312_v8 = vrot.slane %v2693_v0, %v2311_v5 }
 0x21a   :  { %v1277_v1 = vpop.f32.mrf.mxu0  ;;  %2230 = vmatprep.subr.bf16.mxu0 %v3047_v11  ;;  %v1456_v11 = vld [vmem:[%s3385_s8] sm:$0xf]  ;;  %s3213_s8 = smov [#allocation10]  }
 0x21b   :  { %v1323_v16 = vmax.f32 %v1316_v17, 0.0  ;;  %v1318_v21 = vpop.f32.mrf.mxu1  ;;  %v3355_v23 = vpack.c.bf16 %v1322_v19, %v1322_v19  ;;  %v2321_v9 = vcombine.high %v2319_v7, %v2319_v7  ;;  %v1461_v12 = vrot.slane %v1456_v11, %v3316_v29  ;;  %s2414_s9 = sshll.u32 %s3213_s8, 4  ;;  %s2415_s9 = int_to_ptr.vmem [resolvable:$true] %s2414_s9 }
 0x21c   :  { %v1465_v13 = vrot.slane %v1456_v11, %v3322_v33  ;;  %v1469_v29 = vrot.slane %v1456_v11, %v3325_v34  ;;  %v1473_v33 = vrot.slane %v1456_v11, %v3329_v38  ;;  %s3176_s10 = scalar_lea.vmem %s2415_s9, 32  ;;  %p3181_p7 = scmp.lt.s32.totalorder %s2415_s9, %s2415_s9 }
 0x21d   :  { %v1327_v6 = vpack.c.bf16 %v1323_v16, %v1323_v16  ;;  %2231 = vmatpush2.bf16.msra.mxu0 %v3045_v18  ;;  %p3177_p6 = scmp.ne.s32.totalorder %s2415_s9, %s3176_s10  ;;  %p3182_p8 = scmp.lt.s32.totalorder %s3176_s10, %s3176_s10 }
 0x21f   :  { %2191 = vmatprep.mubr.bf16.mxu1 %v1327_v6  ;;  %p3183_p9 = por %p3182_p8, %p3181_p7 }
 0x220   :  { %2192 = vmatmul.mubr.bf16.vlgmr.msra.gmra.mxu1 %v3355_v23  ;;  %2233 = vmatmul.mubr.bf16.vlgmr.msra.gmra.mxu0 %v3348_v36  ;;  %v3068_v36 = vld [vmem:[#allocation8 + $0x22c] ss:$16 sps:$4 sm:$0xff]  }
 0x221   :  { %2242 = vmatpush1.bf16.msra.mxu1 %v3048_v22  ;;  %2273 = vmatprep.mubr.bf16.mxu1 %v1327_v6  ;;  %p3184_p10 = pnand %p3183_p9, %p3177_p6 }
 0x222   :  { %2243 = vmatprep.subr.bf16.mxu1 %v3053_v24  ;;  %2358 = vmatprep.mubr.bf16.mxu0 %v2319_v7 }
 0x225   :  { %2244 = vmatpush1.bf16.msra.mxu1 %v3051_v25 }
 0x226   :  { %2245 = vmatprep.subr.bf16.mxu1 %v3056_v26 }
 0x229   :  { %2246 = vmatpush1.bf16.msra.mxu1 %v3054_v27 }
 0x22a   :  { %2247 = vmatprep.subr.bf16.mxu1 %v3059_v28 }
 0x22d   :  { %2248 = vmatpush1.bf16.msra.mxu1 %v3057_v30 }
 0x22e   :  { %2249 = vmatprep.subr.bf16.mxu1 %v3062_v31 }
 0x231   :  { %2250 = vmatpush1.bf16.msra.mxu1 %v3060_v32 }
 0x232   :  { %2251 = vmatprep.subr.bf16.mxu1 %v3065_v35 }
 0x235   :  { %2252 = vmatpush1.bf16.msra.mxu1 %v3063_v37 }
 0x236   :  { %2253 = vmatprep.subr.bf16.mxu1 %v3068_v36 }
 0x239   :  { %2254 = vmatpush1.bf16.msra.mxu1 %v3066_v39 }
 0x23a   :  { %2255 = vmatprep.subr.bf16.mxu1 %v3071_v40 }
 0x23d   :  { %2256 = vmatpush1.bf16.msra.mxu1 %v3069_v41 }
 0x23e   :  { %2257 = vmatprep.subr.bf16.mxu1 %v3074_v42 }
 0x241   :  { %2258 = vmatpush2.bf16.msra.mxu1 %v3072_v43  ;;  %v2320_v43 = vcombine.high %v2312_v8, %v2312_v8 }
 0x242   :  { %2259 = vmatprep.subr.bf16.mxu1 %v3077_v44 }
 0x245   :  { %2260 = vmatpush2.bf16.msra.mxu1 %v3075_v45 }
 0x246   :  { %2261 = vmatprep.subr.bf16.mxu1 %v3080_v46 }
 0x249   :  { %2262 = vmatpush2.bf16.msra.mxu1 %v3078_v47 }
 0x24a   :  { %2263 = vmatprep.subr.bf16.mxu1 %v3083_v48 }
 0x24d   :  { %2264 = vmatpush2.bf16.msra.mxu1 %v3081_v49 }
 0x24e   :  { %2265 = vmatprep.subr.bf16.mxu1 %v3086_v50 }
 0x251   :  { %2266 = vmatpush2.bf16.msra.mxu1 %v3084_v51 }
 0x252   :  { %2267 = vmatprep.subr.bf16.mxu1 %v3089_v52 }
 0x255   :  { %2268 = vmatpush2.bf16.msra.mxu1 %v3087_v53 }
 0x256   :  { %2269 = vmatprep.subr.bf16.mxu1 %v3092_v54 }
 0x259   :  { %2270 = vmatpush2.bf16.msra.mxu1 %v3090_v55 }
 0x25a   :  { %2271 = vmatprep.subr.bf16.mxu1 %v3095_v56 }
 0x25d   :  { %2272 = vmatpush2.bf16.msra.mxu1 %v3093_v57 }
 0x260   :  { %2274 = vmatmul.mubr.bf16.vlgmr.msra.gmra.mxu1 %v3355_v23 }
 0x261   :  { %2398 = vmatprep.mubr.bf16.mxu1 %v2321_v9 }
 0x293   :  { %v2295_v46 = vpop.permute.xlu0 %2294 }
 0x2a0   :  { %v2152_v58 = vpop.f32.mrf.mxu0 }
 0x2a1   :  { %v2153_v14 = vadd.f32 %v2152_v58, %v1461_v12 }
 0x2a2   :  { %v2154_v59 = vpop.f32.mrf.mxu0 }
 0x2a3   :  { %v2155_v17 = vadd.f32 %v2154_v59, %v1465_v13 }
 0x2a4   :  { %v2156_v62 = vpop.f32.mrf.mxu0 }
 0x2a6   :  { %v2157_v2 = vpop.f32.mrf.mxu0 }
 0x2e0   :  { %v2193_v4 = vpop.f32.mrf.mxu1  ;;  %v2234_v15 = vpop.f32.mrf.mxu0 }
 0x2e1   :  { %v2194_v18 = vadd.f32 %v2193_v4, %v2153_v14  ;;  %v2235_v27 = vadd.f32 %v2234_v15, %v1469_v29 }
 0x2e2   :  { %v2195_v19 = vpop.f32.mrf.mxu1  ;;  %v2236_v1 = vpop.f32.mrf.mxu0 }
 0x2e3   :  { %v2196_v20 = vadd.f32 %v2195_v19, %v2155_v17  ;;  %v2282_v16 = vmax.f32 %v2194_v18, 0.0  ;;  %v2237_v30 = vadd.f32 %v2236_v1, %v1473_v33 }
 0x2e4   :  { %v2197_v21 = vpop.f32.mrf.mxu1  ;;  %v2238_v6 = vpop.f32.mrf.mxu0 }
 0x2e5   :  { %v2283_v22 = vmax.f32 %v2196_v20, 0.0  ;;  %v2286_v26 = vpack.c.bf16 %v2282_v16, %v2282_v16 }
 0x2e6   :  { %v2198_v23 = vpop.f32.mrf.mxu1  ;;  %v2239_v24 = vpop.f32.mrf.mxu0 }
 0x2e7   :  { %v2287_v25 = vpack.c.bf16 %v2283_v22, %v2283_v22 }
 0x2e9   :  { %2340 = vmatprep.subr.bf16.mxu0 %v2287_v25 }
 0x2ea   :  { %2341 = vmatpush1.bf16.xpose.msra.mxu0 %v2286_v26 }
 0x2f1   :  { %2359 = vmatmul.mubr.bf16.vlgmr.msra.gmra.mxu0 %v2312_v8 }
 0x320   :  { %v2275_v28 = vpop.f32.mrf.mxu1 }
 0x321   :  { %v2276_v31 = vadd.f32 %v2275_v28, %v2235_v27 }
 0x322   :  { %v2277_v32 = vpop.f32.mrf.mxu1 }
 0x323   :  { %v2278_v35 = vadd.f32 %v2277_v32, %v2237_v30  ;;  %v2284_v37 = vmax.f32 %v2276_v31, 0.0 }
 0x324   :  { %v2279_v36 = vpop.f32.mrf.mxu1 }
 0x325   :  { %v2285_v39 = vmax.f32 %v2278_v35, 0.0  ;;  %v2288_v42 = vpack.c.bf16 %v2284_v37, %v2284_v37 }
 0x326   :  { %v2280_v40 = vpop.f32.mrf.mxu1 }
 0x327   :  { %v2289_v41 = vpack.c.bf16 %v2285_v39, %v2285_v39 }
 0x329   :  { %2380 = vmatprep.subr.bf16.mxu1 %v2289_v41 }
 0x32a   :  { %2381 = vmatpush1.bf16.xpose.msra.mxu1 %v2288_v42 }
 0x331   :  { %2399 = vmatmul.mubr.bf16.vlgmr.msra.gmra.mxu1 %v2320_v43 }
 0x3b1   :  { %v2360_v44 = vpop.f32.mrf.mxu0 }
 0x3b2   :  { %v2361_v47 = vadd.f32 %v2360_v44, %v2295_v46 }
 0x3b3   :  { %v2362_v34 = vpop.f32.mrf.mxu0 }
 0x3b5   :  { %v2363_v45 = vpop.f32.mrf.mxu0 }
 0x3b7   :  { %v2364_v38 = vpop.f32.mrf.mxu0 }
 0x3f1   :  { %v2400_v48 = vpop.f32.mrf.mxu1 }
 0x3f2   :  { %v2401_v49 = vadd.f32 %v2400_v48, %v2361_v47 }
 0x3f3   :  { %v2402_v50 = vpop.f32.mrf.mxu1 }
 0x3f4   :  { %2407 = vst.msk [vmem:[#allocation10] sm:$0x3] %vm2406_vm4, %v2401_v49 }
 0x3f5   :  { %v2403_v51 = vpop.f32.mrf.mxu1 }
 0x3f6   :  { %3187 = shalt.err (!%p3184_p10)
}
 0x3f7   :  { %2417 = dma.vmem_to_hbm [thread:$0]  %s2415_s9, 32, %s3388_s11, [#allocation4]   ;;  %v2404_v52 = vpop.f32.mrf.mxu1 }
 0x3f8   :  { %3202 = dma.done.wait [#allocation4], 32  }
 0x3f9   :  { %3203 = vsyncadd [#allocation4], 4294967264 }
 0x3fa   :  { %2421 = vsyncpa [#allocation3], 1 }
 0x3fb   :  { %2422 = vsyncpa [#allocation6], 1 }
 0x3fc   :  { %2423 = vsyncpa [#allocation9], 1 }
 0x3fd   :  { %2424 = vsyncpa [#allocation4], 1 }

</bundles_post_ra>
